<compile_context>
chip_gen: v6e
topology: v6e:2x2x1
jax: 0.10.0
libtpu: 0.0.40
codegen_flags: <defaults>
</compile_context>

<pallas_src>
import functools

import jax
import jax.numpy as jnp
from jax import lax
from jax.experimental import pallas as pl
from jax.experimental.pallas import tpu as pltpu


def _block_kernel(x_ref, w1_ref, b1_ref, wdw_ref, b2_ref, w3_ref, b3_ref,
                  o_ref, ypad_ref, *, stride):
    # Shapes (all static).
    Hp, W = x_ref.shape[1], x_ref.shape[2]          # Hp = H + 2 (padded rows)
    cin = x_ref.shape[3]
    planes = w1_ref.shape[1]
    band_h, Wout, cpad = o_ref.shape[1], o_ref.shape[2], o_ref.shape[3]
    R, Wp = ypad_ref.shape[0], ypad_ref.shape[1]    # band rows incl. halo

    b = pl.program_id(1)
    r0p = b * (band_h * stride)        # first padded-x row needed by this band

    # ---- Stage 1: 1x1 conv (BN scale folded into w1) + bias + ReLU6 --------
    # One small matmul per band: (R*W, cin) @ (cin, planes) on the MXU.
    x_slab = x_ref[0, pl.ds(r0p, R), :, :].astype(jnp.float32)     # (R, W, cin)
    y = jnp.dot(x_slab.reshape(R * W, cin), w1_ref[...],
                preferred_element_type=jnp.float32)
    y = jnp.clip(y + b1_ref[...], 0.0, 6.0).reshape(R, W, planes)
    ypad_ref[:, 1:W + 1, :] = y

    # Zero only the thin halo strips; the interior is fully rewritten above.
    ypad_ref[:, 0:1, :] = jnp.zeros((R, 1, planes), jnp.float32)
    ypad_ref[:, W + 1:Wp, :] = jnp.zeros((R, Wp - W - 1, planes), jnp.float32)

    # Rows that fall outside the image must be 0 for the depthwise zero-pad
    # (a zero input row still yields relu6(b1) != 0 after conv1, so overwrite).
    @pl.when(r0p == 0)
    def _zero_top():
        ypad_ref[0, 1:W + 1, :] = jnp.zeros((W, planes), jnp.float32)

    @pl.when(r0p + R == Hp)
    def _zero_bottom():
        ypad_ref[R - 1, 1:W + 1, :] = jnp.zeros((W, planes), jnp.float32)

    # ---- Stage 2: depthwise 3x3 (BN scale folded into taps) + bias + ReLU6 -
    acc = jnp.zeros((band_h, Wout, planes), jnp.float32)
    if stride == 1:
        for dy in range(3):
            # One aligned read per tap-row; dx shifts done in-register.
            slab = ypad_ref[dy:dy + band_h, :, :]          # (band_h, Wp, planes)
            for dx in range(3):
                patch = slab[:, dx:dx + Wout, :]
                tap = wdw_ref[dy * 3 + dx, :].reshape(1, 1, planes)
                acc = acc + patch * tap
    else:
        # TODO(synk): stride>1 falls back to strided VMEM reads; only the
        # stride=1 path is exercised/validated by __main__ on hardware.
        for dy in range(3):
            for dx in range(3):
                patch = ypad_ref[pl.ds(dy, band_h, stride=stride),
                                 pl.ds(dx, Wout, stride=stride), :]
                tap = wdw_ref[dy * 3 + dx, :].reshape(1, 1, planes)
                acc = acc + patch * tap
    z = jnp.clip(acc.reshape(band_h * Wout, planes) + b2_ref[...], 0.0, 6.0)

    # ---- Stage 3: 1x1 conv (BN folded, cout zero-padded to 128 lanes) + bias
    o = jnp.dot(z, w3_ref[...], preferred_element_type=jnp.float32) + b3_ref[...]
    o_ref[...] = o.reshape(1, band_h, Wout, cpad).astype(o_ref.dtype)


def mobilenet_block(x, fp, stride, out_planes):
    """x: (N, H, W, Cin) NHWC; fp: folded params from fold_params()."""
    N, H, W, cin = x.shape
    planes = fp["w1"].shape[1]
    cpad = fp["w3"].shape[1]                 # lane-padded output channels
    Hout = (H - 1) // stride + 1             # k=3, pad=1
    Wout = (W - 1) // stride + 1

    # Largest output-row band <= 8 that divides Hout.
    band_h = 1
    for c in range(1, min(8, Hout) + 1):
        if Hout % c == 0:
            band_h = c
    n_bands = Hout // band_h
    R = (band_h - 1) * stride + 3            # input rows per band (incl. halo)
    Wp = ((W + 2 + 7) // 8) * 8              # padded scratch width (sublanes)

    # Zero-pad H by 1 on each side so band reads never index out of range
    # (the pad rows are re-zeroed post-conv1 inside the kernel).
    xp = jnp.pad(x, ((0, 0), (1, 1), (0, 0), (0, 0)))

    kernel = functools.partial(_block_kernel, stride=stride)

    def _full(shape):
        return pl.BlockSpec(shape, lambda n, b: tuple(0 for _ in shape))

    in_specs = [
        # x stays resident across the band axis (index_map ignores b).
        pl.BlockSpec((1, H + 2, W, cin), lambda n, b: (n, 0, 0, 0)),
        _full((cin, planes)),    # w1 (BN1 scale folded)
        _full((1, planes)),      # b1
        _full((9, planes)),      # depthwise taps (BN2 scale folded)
        _full((1, planes)),      # b2
        _full((planes, cpad)),   # w3 (BN3 scale folded, lane-padded)
        _full((1, cpad)),        # b3 (lane-padded)
    ]

    out_padded = pl.pallas_call(
        kernel,
        out_shape=jax.ShapeDtypeStruct((N, Hout, Wout, cpad), x.dtype),
        grid_spec=pltpu.PrefetchScalarGridSpec(
            num_scalar_prefetch=0,
            grid=(N, n_bands),
            in_specs=in_specs,
            out_specs=pl.BlockSpec((1, band_h, Wout, cpad),
                                   lambda n, b: (n, b, 0, 0)),
            scratch_shapes=[pltpu.VMEM((R, Wp, planes), jnp.float32)],
        ),
        compiler_params=pltpu.CompilerParams(
            dimension_semantics=("parallel", "parallel")),
    )(xp, fp["w1"], fp["b1"], fp["wdw"], fp["b2"], fp["w3"], fp["b3"])

    return out_padded[..., :out_planes]


# ----------------------------- parameters ----------------------------------

def make_params(key, in_planes, out_planes, expansion):
    """Raw module parameters (conv weights + BN running stats), NHWC layout."""
    planes = expansion * in_planes
    ks = jax.random.split(key, 6)

    def bn(k, c):
        k1, k2, k3, k4 = jax.random.split(k, 4)
        gamma = 1.0 + 0.1 * jax.random.normal(k1, (c,), jnp.float32)
        beta = 0.1 * jax.random.normal(k2, (c,), jnp.float32)
        mean = 0.1 * jax.random.normal(k3, (c,), jnp.float32)
        var = jnp.abs(jax.random.normal(k4, (c,), jnp.float32)) + 0.5
        return (gamma, beta, mean, var)

    return dict(
        w1=jax.random.normal(ks[0], (in_planes, planes), jnp.float32) * 0.2,
        wdw=jax.random.normal(ks[1], (9, planes), jnp.float32) * 0.2,
        w3=jax.random.normal(ks[2], (planes, out_planes), jnp.float32) * 0.2,
        bn1=bn(ks[3], planes), bn2=bn(ks[4], planes), bn3=bn(ks[5], out_planes))


def fold_params(rp, eps=1e-5, lane=128):
    """Constant-fold eval-mode BN scales into the conv weights; pad cout to a
    full lane width so the kernel's output store is lane-dense."""
    def scale_bias(p):
        g, b, m, v = p
        s = g / jnp.sqrt(v + eps)
        return s, b - m * s

    s1, b1 = scale_bias(rp["bn1"])
    s2, b2 = scale_bias(rp["bn2"])
    s3, b3 = scale_bias(rp["bn3"])
    cout = rp["w3"].shape[1]
    cpad = ((cout + lane - 1) // lane) * lane
    w3 = jnp.pad(rp["w3"] * s3[None, :], ((0, 0), (0, cpad - cout)))
    b3p = jnp.pad(b3[None, :], ((0, 0), (0, cpad - cout)))
    return dict(w1=rp["w1"] * s1[None, :], b1=b1[None, :],
                wdw=rp["wdw"] * s2[None, :], b2=b2[None, :],
                w3=w3, b3=b3p)


# ----------------------------- reference ------------------------------------

def reference(x, rp, stride, eps=1e-5):
    """Pure-JAX NHWC reference (eval-mode BN, un-folded params)."""
    cin = x.shape[-1]
    planes = rp["w1"].shape[1]
    cout = rp["w3"].shape[1]
    dn = ("NHWC", "HWIO", "NHWC")
    prec = lax.Precision.HIGHEST

    def bn(t, p):
        g, b, m, v = p
        return (t - m) * (g / jnp.sqrt(v + eps)) + b

    y = lax.conv_general_dilated(x, rp["w1"].reshape(1, 1, cin, planes),
                                 (1, 1), "VALID", dimension_numbers=dn,
                                 precision=prec)
    y = jnp.clip(bn(y, rp["bn1"]), 0.0, 6.0)

    z = lax.conv_general_dilated(y, rp["wdw"].reshape(3, 3, 1, planes),
                                 (stride, stride), ((1, 1), (1, 1)),
                                 dimension_numbers=dn,
                                 feature_group_count=planes, precision=prec)
    z = jnp.clip(bn(z, rp["bn2"]), 0.0, 6.0)

    o = lax.conv_general_dilated(z, rp["w3"].reshape(1, 1, planes, cout),
                                 (1, 1), "VALID", dimension_numbers=dn,
                                 precision=prec)
    return bn(o, rp["bn3"])


if __name__ == "__main__":
    # Block(in_planes=4, out_planes=8, expansion=6, stride=1) on a
    # (2, 16, 16, 4) NHWC input (NCHW (2, 4, 16, 16) in the PyTorch module).
    in_planes, out_planes, expansion, stride = 4, 8, 6, 1
    key = jax.random.PRNGKey(0)
    kx, kp = jax.random.split(key)

    x = jax.random.normal(kx, (2, 16, 16, in_planes), jnp.float32)
    raw = make_params(kp, in_planes, out_planes, expansion)
    folded = fold_params(raw)            # construction-time constant folding

    out = jax.block_until_ready(mobilenet_block(x, folded, stride, out_planes))
    ref = jax.block_until_ready(reference(x, raw, stride))

    assert out.shape == ref.shape, (out.shape, ref.shape)
    assert jnp.allclose(out, ref, rtol=1e-4, atol=1e-4), (
        float(jnp.max(jnp.abs(out - ref))))

    print("KERNEL_OK")
</pallas_src>

<mosaic_0001>
module attributes {stable_mosaic.version = 11 : i64} {
  func.func @_block_kernel(%arg0: i32, %arg1: i32, %arg2: memref<1x18x16x4xf32, #tpu.memory_space<vmem>>, %arg3: memref<4x24xf32, #tpu.memory_space<vmem>>, %arg4: memref<1x24xf32, #tpu.memory_space<vmem>>, %arg5: memref<9x24xf32, #tpu.memory_space<vmem>>, %arg6: memref<1x24xf32, #tpu.memory_space<vmem>>, %arg7: memref<24x128xf32, #tpu.memory_space<vmem>>, %arg8: memref<1x128xf32, #tpu.memory_space<vmem>>, %arg9: memref<1x8x16x128xf32, #tpu.memory_space<vmem>>, %arg10: memref<10x24x24xf32, #tpu.memory_space<vmem>>) attributes {dimension_semantics = [#tpu.dimension_semantics<parallel>, #tpu.dimension_semantics<parallel>], iteration_bounds = array<i64: 2, 2>, scalar_prefetch = 0 : i64, scratch_operands = 1 : i64, tpu.core_type = #tpu.core_type<tc>, window_params = [{transform_indices = @transform_0, window_bounds = array<i64: 1, 18, 16, 4>}, {pipeline_mode = #tpu.pipeline_mode<synchronous>, transform_indices = @transform_1, window_bounds = array<i64: 4, 24>}, {pipeline_mode = #tpu.pipeline_mode<synchronous>, transform_indices = @transform_2, window_bounds = array<i64: 1, 24>}, {pipeline_mode = #tpu.pipeline_mode<synchronous>, transform_indices = @transform_3, window_bounds = array<i64: 9, 24>}, {pipeline_mode = #tpu.pipeline_mode<synchronous>, transform_indices = @transform_4, window_bounds = array<i64: 1, 24>}, {pipeline_mode = #tpu.pipeline_mode<synchronous>, transform_indices = @transform_5, window_bounds = array<i64: 24, 128>}, {pipeline_mode = #tpu.pipeline_mode<synchronous>, transform_indices = @transform_6, window_bounds = array<i64: 1, 128>}, {transform_indices = @transform_7, window_bounds = array<i64: 1, 8, 16, 128>}]} {
    %c8_i32 = arith.constant 8 : i32
    %0 = arith.muli %arg1, %c8_i32 : i32
    %c0 = arith.constant 0 : index
    %1 = arith.index_cast %0 : i32 to index
    %c0_0 = arith.constant 0 : index
    %c0_1 = arith.constant 0 : index
    %2 = vector.load %arg2[%c0, %1, %c0_0, %c0_1] : memref<1x18x16x4xf32, #tpu.memory_space<vmem>>, vector<1x10x16x4xf32>
    %3 = vector.shape_cast %2 : vector<1x10x16x4xf32> to vector<10x16x4xf32>
    %4 = vector.shape_cast %3 : vector<10x16x4xf32> to vector<160x4xf32>
    %c0_2 = arith.constant 0 : index
    %c0_3 = arith.constant 0 : index
    %5 = vector.load %arg3[%c0_2, %c0_3] : memref<4x24xf32, #tpu.memory_space<vmem>>, vector<4x24xf32>
    %cst = arith.constant dense<0.000000e+00> : vector<160x24xf32>
    %6 = tpu.matmul %4, %5, %cst {dimension_numbers = #tpu.dot_dimension_numbers<[1], [0], [0], [1], [0, 0, 1, 1], [], []>} : vector<160x4xf32>, vector<4x24xf32>, vector<160x24xf32> -> vector<160x24xf32>
    %c0_4 = arith.constant 0 : index
    %c0_5 = arith.constant 0 : index
    %7 = vector.load %arg4[%c0_4, %c0_5] : memref<1x24xf32, #tpu.memory_space<vmem>>, vector<1x24xf32>
    %8 = vector.broadcast %7 : vector<1x24xf32> to vector<160x24xf32>
    %9 = arith.addf %6, %8 : vector<160x24xf32>
    %cst_6 = arith.constant 0.000000e+00 : f32
    %cst_7 = arith.constant 6.000000e+00 : f32
    %10 = vector.broadcast %cst_6 : f32 to vector<160x24xf32>
    %11 = arith.maximumf %10, %9 : vector<160x24xf32>
    %12 = vector.broadcast %cst_7 : f32 to vector<160x24xf32>
    %13 = arith.minimumf %12, %11 : vector<160x24xf32>
    %14 = vector.shape_cast %13 : vector<160x24xf32> to vector<10x16x24xf32>
    %c0_8 = arith.constant 0 : index
    %c1 = arith.constant 1 : index
    %c0_9 = arith.constant 0 : index
    %15 = vector.load %arg10[%c0_8, %c1, %c0_9] : memref<10x24x24xf32, #tpu.memory_space<vmem>>, vector<10x16x24xf32>
    tpu.vector_store %arg10[%c0_8, %c1, %c0_9], %14 {strides = array<i32>} : memref<10x24x24xf32, #tpu.memory_space<vmem>>, vector<10x16x24xf32>,
    %cst_10 = arith.constant 0.000000e+00 : f32
    %16 = vector.broadcast %cst_10 : f32 to vector<10x1x24xf32>
    %c0_11 = arith.constant 0 : index
    %c0_12 = arith.constant 0 : index
    %c0_13 = arith.constant 0 : index
    %17 = vector.load %arg10[%c0_11, %c0_12, %c0_13] : memref<10x24x24xf32, #tpu.memory_space<vmem>>, vector<10x1x24xf32>
    tpu.vector_store %arg10[%c0_11, %c0_12, %c0_13], %16 {strides = array<i32>} : memref<10x24x24xf32, #tpu.memory_space<vmem>>, vector<10x1x24xf32>,
    %cst_14 = arith.constant 0.000000e+00 : f32
    %18 = vector.broadcast %cst_14 : f32 to vector<10x7x24xf32>
    %c0_15 = arith.constant 0 : index
    %c17 = arith.constant 17 : index
    %c0_16 = arith.constant 0 : index
    %19 = vector.load %arg10[%c0_15, %c17, %c0_16] : memref<10x24x24xf32, #tpu.memory_space<vmem>>, vector<10x7x24xf32>
    tpu.vector_store %arg10[%c0_15, %c17, %c0_16], %18 {strides = array<i32>} : memref<10x24x24xf32, #tpu.memory_space<vmem>>, vector<10x7x24xf32>,
    %c0_i32 = arith.constant 0 : i32
    %20 = arith.cmpi eq, %0, %c0_i32 : i32
    %21 = arith.extui %20 : i1 to i32
    %c0_i32_17 = arith.constant 0 : i32
    %22 = arith.cmpi ne, %21, %c0_i32_17 : i32
    scf.if %22 {
      %cst_53 = arith.constant 0.000000e+00 : f32
      %109 = vector.broadcast %cst_53 : f32 to vector<16x24xf32>
      %c0_54 = arith.constant 0 : index
      %c1_55 = arith.constant 1 : index
      %c0_56 = arith.constant 0 : index
      %110 = vector.load %arg10[%c0_54, %c1_55, %c0_56] : memref<10x24x24xf32, #tpu.memory_space<vmem>>, vector<1x16x24xf32>
      %111 = vector.shape_cast %110 : vector<1x16x24xf32> to vector<16x24xf32>
      %112 = vector.shape_cast %109 : vector<16x24xf32> to vector<1x16x24xf32>
      tpu.vector_store %arg10[%c0_54, %c1_55, %c0_56], %112 {strides = array<i32>} : memref<10x24x24xf32, #tpu.memory_space<vmem>>, vector<1x16x24xf32>,
    } else {
    }
    %c10_i32 = arith.constant 10 : i32
    %23 = arith.addi %0, %c10_i32 : i32
    %c18_i32 = arith.constant 18 : i32
    %24 = arith.cmpi eq, %23, %c18_i32 : i32
    %25 = arith.extui %24 : i1 to i32
    %c0_i32_18 = arith.constant 0 : i32
    %26 = arith.cmpi ne, %25, %c0_i32_18 : i32
    scf.if %26 {
      %cst_53 = arith.constant 0.000000e+00 : f32
      %109 = vector.broadcast %cst_53 : f32 to vector<16x24xf32>
      %c9 = arith.constant 9 : index
      %c1_54 = arith.constant 1 : index
      %c0_55 = arith.constant 0 : index
      %110 = vector.load %arg10[%c9, %c1_54, %c0_55] : memref<10x24x24xf32, #tpu.memory_space<vmem>>, vector<1x16x24xf32>
      %111 = vector.shape_cast %110 : vector<1x16x24xf32> to vector<16x24xf32>
      %112 = vector.shape_cast %109 : vector<16x24xf32> to vector<1x16x24xf32>
      tpu.vector_store %arg10[%c9, %c1_54, %c0_55], %112 {strides = array<i32>} : memref<10x24x24xf32, #tpu.memory_space<vmem>>, vector<1x16x24xf32>,
    } else {
    }
    %cst_19 = arith.constant 0.000000e+00 : f32
    %27 = vector.broadcast %cst_19 : f32 to vector<8x16x24xf32>
    %c0_20 = arith.constant 0 : index
    %c0_21 = arith.constant 0 : index
    %c0_22 = arith.constant 0 : index
    %28 = vector.load %arg10[%c0_20, %c0_21, %c0_22] : memref<10x24x24xf32, #tpu.memory_space<vmem>>, vector<8x24x24xf32>
    %29 = vector.extract_strided_slice %28 {offsets = [0, 0, 0], sizes = [8, 16, 24], strides = [1, 1, 1]} : vector<8x24x24xf32> to vector<8x16x24xf32>
    %c0_23 = arith.constant 0 : index
    %c0_24 = arith.constant 0 : index
    %30 = vector.load %arg5[%c0_23, %c0_24] : memref<9x24xf32, #tpu.memory_space<vmem>>, vector<1x24xf32>
    %31 = vector.shape_cast %30 : vector<1x24xf32> to vector<24xf32>
    %32 = vector.shape_cast %31 : vector<24xf32> to vector<1x1x24xf32>
    %33 = vector.broadcast %32 : vector<1x1x24xf32> to vector<8x16x24xf32>
    %34 = arith.mulf %29, %33 : vector<8x16x24xf32>
    %35 = arith.addf %27, %34 : vector<8x16x24xf32>
    %36 = vector.extract_strided_slice %28 {offsets = [0, 1, 0], sizes = [8, 16, 24], strides = [1, 1, 1]} : vector<8x24x24xf32> to vector<8x16x24xf32>
    %c1_25 = arith.constant 1 : index
    %c0_26 = arith.constant 0 : index
    %37 = vector.load %arg5[%c1_25, %c0_26] : memref<9x24xf32, #tpu.memory_space<vmem>>, vector<1x24xf32>
    %38 = vector.shape_cast %37 : vector<1x24xf32> to vector<24xf32>
    %39 = vector.shape_cast %38 : vector<24xf32> to vector<1x1x24xf32>
    %40 = vector.broadcast %39 : vector<1x1x24xf32> to vector<8x16x24xf32>
    %41 = arith.mulf %36, %40 : vector<8x16x24xf32>
    %42 = arith.addf %35, %41 : vector<8x16x24xf32>
    %43 = vector.extract_strided_slice %28 {offsets = [0, 2, 0], sizes = [8, 16, 24], strides = [1, 1, 1]} : vector<8x24x24xf32> to vector<8x16x24xf32>
    %c2 = arith.constant 2 : index
    %c0_27 = arith.constant 0 : index
    %44 = vector.load %arg5[%c2, %c0_27] : memref<9x24xf32, #tpu.memory_space<vmem>>, vector<1x24xf32>
    %45 = vector.shape_cast %44 : vector<1x24xf32> to vector<24xf32>
    %46 = vector.shape_cast %45 : vector<24xf32> to vector<1x1x24xf32>
    %47 = vector.broadcast %46 : vector<1x1x24xf32> to vector<8x16x24xf32>
    %48 = arith.mulf %43, %47 : vector<8x16x24xf32>
    %49 = arith.addf %42, %48 : vector<8x16x24xf32>
    %c1_28 = arith.constant 1 : index
    %c0_29 = arith.constant 0 : index
    %c0_30 = arith.constant 0 : index
    %50 = vector.load %arg10[%c1_28, %c0_29, %c0_30] : memref<10x24x24xf32, #tpu.memory_space<vmem>>, vector<8x24x24xf32>
    %51 = vector.extract_strided_slice %50 {offsets = [0, 0, 0], sizes = [8, 16, 24], strides = [1, 1, 1]} : vector<8x24x24xf32> to vector<8x16x24xf32>
    %c3 = arith.constant 3 : index
    %c0_31 = arith.constant 0 : index
    %52 = vector.load %arg5[%c3, %c0_31] : memref<9x24xf32, #tpu.memory_space<vmem>>, vector<1x24xf32>
    %53 = vector.shape_cast %52 : vector<1x24xf32> to vector<24xf32>
    %54 = vector.shape_cast %53 : vector<24xf32> to vector<1x1x24xf32>
    %55 = vector.broadcast %54 : vector<1x1x24xf32> to vector<8x16x24xf32>
    %56 = arith.mulf %51, %55 : vector<8x16x24xf32>
    %57 = arith.addf %49, %56 : vector<8x16x24xf32>
    %58 = vector.extract_strided_slice %50 {offsets = [0, 1, 0], sizes = [8, 16, 24], strides = [1, 1, 1]} : vector<8x24x24xf32> to vector<8x16x24xf32>
    %c4 = arith.constant 4 : index
    %c0_32 = arith.constant 0 : index
    %59 = vector.load %arg5[%c4, %c0_32] : memref<9x24xf32, #tpu.memory_space<vmem>>, vector<1x24xf32>
    %60 = vector.shape_cast %59 : vector<1x24xf32> to vector<24xf32>
    %61 = vector.shape_cast %60 : vector<24xf32> to vector<1x1x24xf32>
    %62 = vector.broadcast %61 : vector<1x1x24xf32> to vector<8x16x24xf32>
    %63 = arith.mulf %58, %62 : vector<8x16x24xf32>
    %64 = arith.addf %57, %63 : vector<8x16x24xf32>
    %65 = vector.extract_strided_slice %50 {offsets = [0, 2, 0], sizes = [8, 16, 24], strides = [1, 1, 1]} : vector<8x24x24xf32> to vector<8x16x24xf32>
    %c5 = arith.constant 5 : index
    %c0_33 = arith.constant 0 : index
    %66 = vector.load %arg5[%c5, %c0_33] : memref<9x24xf32, #tpu.memory_space<vmem>>, vector<1x24xf32>
    %67 = vector.shape_cast %66 : vector<1x24xf32> to vector<24xf32>
    %68 = vector.shape_cast %67 : vector<24xf32> to vector<1x1x24xf32>
    %69 = vector.broadcast %68 : vector<1x1x24xf32> to vector<8x16x24xf32>
    %70 = arith.mulf %65, %69 : vector<8x16x24xf32>
    %71 = arith.addf %64, %70 : vector<8x16x24xf32>
    %c2_34 = arith.constant 2 : index
    %c0_35 = arith.constant 0 : index
    %c0_36 = arith.constant 0 : index
    %72 = vector.load %arg10[%c2_34, %c0_35, %c0_36] : memref<10x24x24xf32, #tpu.memory_space<vmem>>, vector<8x24x24xf32>
    %73 = vector.extract_strided_slice %72 {offsets = [0, 0, 0], sizes = [8, 16, 24], strides = [1, 1, 1]} : vector<8x24x24xf32> to vector<8x16x24xf32>
    %c6 = arith.constant 6 : index
    %c0_37 = arith.constant 0 : index
    %74 = vector.load %arg5[%c6, %c0_37] : memref<9x24xf32, #tpu.memory_space<vmem>>, vector<1x24xf32>
    %75 = vector.shape_cast %74 : vector<1x24xf32> to vector<24xf32>
    %76 = vector.shape_cast %75 : vector<24xf32> to vector<1x1x24xf32>
    %77 = vector.broadcast %76 : vector<1x1x24xf32> to vector<8x16x24xf32>
    %78 = arith.mulf %73, %77 : vector<8x16x24xf32>
    %79 = arith.addf %71, %78 : vector<8x16x24xf32>
    %80 = vector.extract_strided_slice %72 {offsets = [0, 1, 0], sizes = [8, 16, 24], strides = [1, 1, 1]} : vector<8x24x24xf32> to vector<8x16x24xf32>
    %c7 = arith.constant 7 : index
    %c0_38 = arith.constant 0 : index
    %81 = vector.load %arg5[%c7, %c0_38] : memref<9x24xf32, #tpu.memory_space<vmem>>, vector<1x24xf32>
    %82 = vector.shape_cast %81 : vector<1x24xf32> to vector<24xf32>
    %83 = vector.shape_cast %82 : vector<24xf32> to vector<1x1x24xf32>
    %84 = vector.broadcast %83 : vector<1x1x24xf32> to vector<8x16x24xf32>
    %85 = arith.mulf %80, %84 : vector<8x16x24xf32>
    %86 = arith.addf %79, %85 : vector<8x16x24xf32>
    %87 = vector.extract_strided_slice %72 {offsets = [0, 2, 0], sizes = [8, 16, 24], strides = [1, 1, 1]} : vector<8x24x24xf32> to vector<8x16x24xf32>
    %c8 = arith.constant 8 : index
    %c0_39 = arith.constant 0 : index
    %88 = vector.load %arg5[%c8, %c0_39] : memref<9x24xf32, #tpu.memory_space<vmem>>, vector<1x24xf32>
    %89 = vector.shape_cast %88 : vector<1x24xf32> to vector<24xf32>
    %90 = vector.shape_cast %89 : vector<24xf32> to vector<1x1x24xf32>
    %91 = vector.broadcast %90 : vector<1x1x24xf32> to vector<8x16x24xf32>
    %92 = arith.mulf %87, %91 : vector<8x16x24xf32>
    %93 = arith.addf %86, %92 : vector<8x16x24xf32>
    %94 = vector.shape_cast %93 : vector<8x16x24xf32> to vector<128x24xf32>
    %c0_40 = arith.constant 0 : index
    %c0_41 = arith.constant 0 : index
    %95 = vector.load %arg6[%c0_40, %c0_41] : memref<1x24xf32, #tpu.memory_space<vmem>>, vector<1x24xf32>
    %96 = vector.broadcast %95 : vector<1x24xf32> to vector<128x24xf32>
    %97 = arith.addf %94, %96 : vector<128x24xf32>
    %cst_42 = arith.constant 0.000000e+00 : f32
    %cst_43 = arith.constant 6.000000e+00 : f32
    %98 = vector.broadcast %cst_42 : f32 to vector<128x24xf32>
    %99 = arith.maximumf %98, %97 : vector<128x24xf32>
    %100 = vector.broadcast %cst_43 : f32 to vector<128x24xf32>
    %101 = arith.minimumf %100, %99 : vector<128x24xf32>
    %c0_44 = arith.constant 0 : index
    %c0_45 = arith.constant 0 : index
    %102 = vector.load %arg7[%c0_44, %c0_45] : memref<24x128xf32, #tpu.memory_space<vmem>>, vector<24x128xf32>
    %cst_46 = arith.constant dense<0.000000e+00> : vector<128x128xf32>
    %103 = tpu.matmul %101, %102, %cst_46 {dimension_numbers = #tpu.dot_dimension_numbers<[1], [0], [0], [1], [0, 0, 1, 1], [], []>} : vector<128x24xf32>, vector<24x128xf32>, vector<128x128xf32> -> vector<128x128xf32>
    %c0_47 = arith.constant 0 : index
    %c0_48 = arith.constant 0 : index
    %104 = vector.load %arg8[%c0_47, %c0_48] : memref<1x128xf32, #tpu.memory_space<vmem>>, vector<1x128xf32>
    %105 = vector.broadcast %104 : vector<1x128xf32> to vector<128x128xf32>
    %106 = arith.addf %103, %105 : vector<128x128xf32>
    %107 = vector.shape_cast %106 : vector<128x128xf32> to vector<1x8x16x128xf32>
    %c0_49 = arith.constant 0 : index
    %c0_50 = arith.constant 0 : index
    %c0_51 = arith.constant 0 : index
    %c0_52 = arith.constant 0 : index
    %108 = vector.load %arg9[%c0_49, %c0_50, %c0_51, %c0_52] : memref<1x8x16x128xf32, #tpu.memory_space<vmem>>, vector<1x8x16x128xf32>
    tpu.vector_store %arg9[%c0_49, %c0_50, %c0_51, %c0_52], %107 {strides = array<i32>} : memref<1x8x16x128xf32, #tpu.memory_space<vmem>>, vector<1x8x16x128xf32>,
    return
  }
  func.func @transform_0(%arg0: i32, %arg1: i32) -> (i32, i32, i32, i32) {
    %c0_i32 = arith.constant 0 : i32
    %c0_i32_0 = arith.constant 0 : i32
    %c0_i32_1 = arith.constant 0 : i32
    %c0_i32_2 = arith.constant 0 : i32
    return %arg0, %c0_i32, %c0_i32_0, %c0_i32_1 : i32, i32, i32, i32
  }
  func.func @transform_1(%arg0: i32, %arg1: i32) -> (i32, i32) {
    %c0_i32 = arith.constant 0 : i32
    %c0_i32_0 = arith.constant 0 : i32
    %c0_i32_1 = arith.constant 0 : i32
    return %c0_i32, %c0_i32_0 : i32, i32
  }
  func.func @transform_2(%arg0: i32, %arg1: i32) -> (i32, i32) {
    %c0_i32 = arith.constant 0 : i32
    %c0_i32_0 = arith.constant 0 : i32
    %c0_i32_1 = arith.constant 0 : i32
    return %c0_i32, %c0_i32_0 : i32, i32
  }
  func.func @transform_3(%arg0: i32, %arg1: i32) -> (i32, i32) {
    %c0_i32 = arith.constant 0 : i32
    %c0_i32_0 = arith.constant 0 : i32
    %c0_i32_1 = arith.constant 0 : i32
    return %c0_i32, %c0_i32_0 : i32, i32
  }
  func.func @transform_4(%arg0: i32, %arg1: i32) -> (i32, i32) {
    %c0_i32 = arith.constant 0 : i32
    %c0_i32_0 = arith.constant 0 : i32
    %c0_i32_1 = arith.constant 0 : i32
    return %c0_i32, %c0_i32_0 : i32, i32
  }
  func.func @transform_5(%arg0: i32, %arg1: i32) -> (i32, i32) {
    %c0_i32 = arith.constant 0 : i32
    %c0_i32_0 = arith.constant 0 : i32
    %c0_i32_1 = arith.constant 0 : i32
    return %c0_i32, %c0_i32_0 : i32, i32
  }
  func.func @transform_6(%arg0: i32, %arg1: i32) -> (i32, i32) {
    %c0_i32 = arith.constant 0 : i32
    %c0_i32_0 = arith.constant 0 : i32
    %c0_i32_1 = arith.constant 0 : i32
    return %c0_i32, %c0_i32_0 : i32, i32
  }
  func.func @transform_7(%arg0: i32, %arg1: i32) -> (i32, i32, i32, i32) {
    %c0_i32 = arith.constant 0 : i32
    %c0_i32_0 = arith.constant 0 : i32
    %c0_i32_1 = arith.constant 0 : i32
    return %arg0, %arg1, %c0_i32, %c0_i32_0 : i32, i32, i32, i32
  }
}

</mosaic_0001>

<bundles_post_ra>
// kernel: tpu_custom_call.1
= control target key start
LH: loop header
LB: loop body
LE: loop exit
PB: predicated region body
PF: predicated region fallthrough
CT: control target
= control target key end

     0   :  { %12 = vsyncpa [#allocation4], 0  ;;  %s3385_s0 = inlined_call_operand.vmem [shape: f32[2,18,16,4], index: 0, kind: input, shape index: {}]   ;;  %s3386_s1 = inlined_call_operand.vmem [shape: f32[4,24], index: 1, kind: input, shape index: {}]   ;;  %s3387_s2 = inlined_call_operand.vmem [shape: f32[1,24], index: 2, kind: input, shape index: {}]   ;;  %s3388_s3 = inlined_call_operand.vmem [shape: f32[9,24], index: 3, kind: input, shape index: {}]   ;;  %s3389_s4 = inlined_call_operand.vmem [shape: f32[1,24], index: 4, kind: input, shape index: {}]   ;;  %s3390_s5 = inlined_call_operand.vmem [shape: f32[24,128], index: 5, kind: input, shape index: {}]   ;;  %s3391_s6 = inlined_call_operand.vmem [shape: f32[1,128], index: 6, kind: input, shape index: {}]   ;;  %s3392_s7 = inlined_call_operand.hbm [shape: f32[2,16,16,128], index: 7, kind: output, shape index: {}]  }
   0x1   :  { %14 = vsyncpa [#allocation4 + $0x1], 0  ;;  %s2354_s24 = smov 0   ;;  %s2356_s25 = smov 0  }
   0x2   :  { %s2358_s26 = smov 0   ;;  %s2360_s27 = smov 0  }
   0x3   :  { %s2362_s28 = smov 0   ;;  %s2364_s29 = smov 0  }
   0x4   :  { %s2366_s30 = smov 0   ;;  %s2368_s8 = smov 0  }
   0x5 LB: > { %s1956_s9 = sadd.s32 4294967295, %s2306_s8   ;;  %s1957_s10 = sadd.s32 4294967294, %s2306_s8   ;;  %s2306_s8 = sphi %s2368_s8, %s20_s8   ;;  %s2302_s30 = sphi %s2366_s30, %s3406_s30   ;;  %s2298_s29 = sphi %s2364_s29, %s3405_s29   ;;  %s2294_s28 = sphi %s2362_s28, %s3404_s28   ;;  %s2290_s27 = sphi %s2360_s27, %s3403_s27   ;;  %s2286_s26 = sphi %s2358_s26, %s3402_s26   ;;  %s2282_s25 = sphi %s2356_s25, %s3401_s25   ;;  %s2278_s24 = sphi %s2354_s24, %s3400_s24  }
   0x6   : > { %s29_s11 = sadd.s32 1, %s2298_s29  ;;  %s32_s12 = sadd.s32 1, %s2302_s30 }
   0x7   : > { %p30_p0 = scmp.ge.s32.totalorder %s29_s11, 2  ;;  %p203_p1 = scmp.ne.s32.totalorder %s2286_s26, %s2282_s25 }
   0x8   : > { %p204_p2 = scmp.eq.s32.totalorder %s1956_s9, 3  ;;  %p209_p5 = scmp.ne.s32.totalorder %s2282_s25, %s2278_s24 }
   0x9   : > { %s3408_s11 = smov (%p30_p0, %s29_s11), 0  ;;  %s3410_s12 = smov (!%p30_p0, %s32_s12), %s2302_s30 }
   0xa   : > { %s189_s13 = ssub.s32 %s2298_s29, %s3408_s11  ;;  %p2405_p3 = por %p204_p2, %p203_p1 }
   0xb   : > { %p34_p4 = scmp.ge.s32.totalorder %s3410_s12, 2  ;;  %p210_p6 = scmp.eq.s32.totalorder %s1957_s10, 3 }
   0xc   : > { %p1960_p7 = scmp.ge.s32.totalorder %s2306_s8, 1  ;;  %p254_p9 = scmp.lt.s32.totalorder %s2306_s8, 5 }
   0xd   : > { %s3412_s12 = smov (%p34_p4, %s3410_s12), 0  ;;  %p2414_p8 = por %p210_p6, %p209_p5 }
   0xe   : > { %3395 = sst [smem:[#allocation6_spill]] %s3412_s12  ;;  %s188_s16 = ssub.s32 %s2302_s30, %s3412_s12 }
   0xf   : > { %s193_s17 = sadd.s32 1, %s2286_s26  ;;  %s190_s18 = sor.u32 %s189_s13, %s188_s16 }
  0x10   : > { %p255_p10 = pnand %p1960_p7, %p254_p9  ;;  %p191_p11 = scmp.eq.s32.totalorder %s190_s18, 0 }
  0x11   : > { %s283_s20 = sand.u32 (!%p255_p10), 1, %s2282_s25   ;;  %p286_p12 = scmp.lt.s32.totalorder (!%p255_p10), %s2294_s28, 1 }
  0x12   : > { %s2423_s19 = scalar_select %p191_p11, %s2286_s26, %s193_s17  }
  0x13   : > { %258 = sbr.rel (%p255_p10) target bundleno = 664 (0x298), region = 48  ;;  %s2432_s9 = sshll.u32 (!%p255_p10), %s283_s20, 7 }
  0x14   : > { %s2023_s16 = sshll.u32 (!%p255_p10), %s2290_s27, 7  ;;  %s2538_s22 = scalar_lea.vmem (!%p255_p10), [#allocation3], %s2432_s9 }
  0x15   : > { %s3397_s23 = sshll.u32 (!%p255_p10), %s2290_s27, 3 }
  0x16   : > { %p1987_p13 = scmp.ne.s32.totalorder (!%p255_p10), %s3397_s23, 0 }
  0x18   : > { %v315_v0 = vld [vmem:[%s3386_s1] sm:$0xf]  ;;  %vm384_vm0 = vcmask 1043456   ;;  %s287_s10 = scalar_select %p286_p12, %s2294_s28, 1  ;;  %vm323_vm1 = vcmask 31744   ;;  %vm614_vm2 = vcmask 188416  }
  0x19   : > { %2065 = vmatprep.subr.msk.mxu0 %vm384_vm0, %v315_v0  ;;  %vm625_vm3 = vcmask 194560   ;;  %v2308_v21 = vmov 0.0   ;;  %v2495_v22 = vld [vmem:[%s3387_s2] ss:$0 sm:$0xff]  ;;  %vm593_vm4 = vcmask 195584  }
  0x1a   : > { %2066 = vmatpush3.msk.msra.mxu0 %vm384_vm0, %v315_v0  ;;  %s2127_s13 = smul.u32 288, %s287_s10  ;;  %615 = vst.msk [vmem:[#allocation2] sm:$0x1] %vm614_vm2, %v2308_v21  ;;  %616 = vst.msk [vmem:[#allocation2 + $0x18] sm:$0x1] %vm614_vm2, %v2308_v21 }
  0x1b   : > { %617 = vst.msk [vmem:[#allocation2 + $0x30] sm:$0x1] %vm614_vm2, %v2308_v21  ;;  %618 = vst.msk [vmem:[#allocation2 + $0x48] sm:$0x1] %vm614_vm2, %v2308_v21 }
  0x1c   : > { %s290_s12 = scalar_lea.vmem %s3385_s0, %s2127_s13  ;;  %619 = vst.msk [vmem:[#allocation2 + $0x60] sm:$0x1] %vm614_vm2, %v2308_v21  ;;  %620 = vst.msk [vmem:[#allocation2 + $0x78] sm:$0x1] %vm614_vm2, %v2308_v21 }
  0x1d   : > { %s2440_s21 = scalar_lea.vmem %s290_s12, %s2023_s16  ;;  %621 = vst.msk [vmem:[#allocation2 + $0x90] sm:$0x1] %vm614_vm2, %v2308_v21  ;;  %622 = vst.msk [vmem:[#allocation2 + $0xa8] sm:$0x1] %vm614_vm2, %v2308_v21 }
  0x1e   : > { %v295_v1 = vld [vmem:[%s2440_s21] sm:$0xff]  ;;  %v296_v2 = vld [vmem:[%s2440_s21 + $0x8] sm:$0xff]  ;;  %v297_v3 = vld [vmem:[%s2440_s21 + $0x10] sm:$0xff]  ;;  %623 = vst.msk [vmem:[#allocation2 + $0xc0] sm:$0x1] %vm614_vm2, %v2308_v21 }
  0x1f   : > { %2067 = vmatprep.mubr.msk.f32.mxu0 %vm323_vm1, %v295_v1  ;;  %v298_v4 = vld [vmem:[%s2440_s21 + $0x18] sm:$0xff]  ;;  %v299_v5 = vld [vmem:[%s2440_s21 + $0x20] sm:$0xff]  ;;  %v300_v6 = vld [vmem:[%s2440_s21 + $0x28] sm:$0xff]  ;;  %624 = vst.msk [vmem:[#allocation2 + $0xd8] sm:$0x1] %vm614_vm2, %v2308_v21 }
  0x20   : > { %2068 = vmatmul.mubr.msk.f32.vlgmr.msra.gmra.mxu0 %vm323_vm1, %v296_v2  ;;  %v301_v7 = vld [vmem:[%s2440_s21 + $0x30] sm:$0xff]  ;;  %v302_v8 = vld [vmem:[%s2440_s21 + $0x38] sm:$0xff]  ;;  %v303_v9 = vld [vmem:[%s2440_s21 + $0x40] sm:$0xff]  ;;  %626 = vst.msk [vmem:[#allocation2 + $0x11] sm:$0x7f] %vm625_vm3, %v2308_v21 }
  0x21   : > { %2070 = vmatprep.mubr.msk.f32.mxu0 %vm323_vm1, %v297_v3  ;;  %v304_v10 = vld [vmem:[%s2440_s21 + $0x48] sm:$0xff]  ;;  %v305_v11 = vld [vmem:[%s2440_s21 + $0x50] sm:$0xff]  ;;  %v306_v12 = vld [vmem:[%s2440_s21 + $0x58] sm:$0xff]  ;;  %627 = vst.msk [vmem:[#allocation2 + $0x29] sm:$0x7f] %vm625_vm3, %v2308_v21 }
  0x22   : > { %v307_v13 = vld [vmem:[%s2440_s21 + $0x60] sm:$0xff]  ;;  %v308_v14 = vld [vmem:[%s2440_s21 + $0x68] sm:$0xff]  ;;  %v309_v15 = vld [vmem:[%s2440_s21 + $0x70] sm:$0xff]  ;;  %628 = vst.msk [vmem:[#allocation2 + $0x41] sm:$0x7f] %vm625_vm3, %v2308_v21 }
  0x23   : > { %v310_v16 = vld [vmem:[%s2440_s21 + $0x78] sm:$0xff]  ;;  %v311_v17 = vld [vmem:[%s2440_s21 + $0x80] sm:$0xff]  ;;  %v312_v18 = vld [vmem:[%s2440_s21 + $0x88] sm:$0xff]  ;;  %629 = vst.msk [vmem:[#allocation2 + $0x59] sm:$0x7f] %vm625_vm3, %v2308_v21 }
  0x24   : > { %2071 = vmatmul.mubr.msk.f32.gmra.mxu0 %vm323_vm1, %v298_v4  ;;  %v313_v19 = vld [vmem:[%s2440_s21 + $0x90] sm:$0xff]  ;;  %v314_v20 = vld [vmem:[%s2440_s21 + $0x98] sm:$0xff]  ;;  %630 = vst.msk [vmem:[#allocation2 + $0x71] sm:$0x7f] %vm625_vm3, %v2308_v21  ;;  %631 = vst.msk [vmem:[#allocation2 + $0x89] sm:$0x7f] %vm625_vm3, %v2308_v21 }
  0x25   : > { %2073 = vmatprep.mubr.msk.f32.mxu0 %vm323_vm1, %v299_v5  ;;  %632 = vst.msk [vmem:[#allocation2 + $0xa1] sm:$0x7f] %vm625_vm3, %v2308_v21  ;;  %633 = vst.msk [vmem:[#allocation2 + $0xb9] sm:$0x7f] %vm625_vm3, %v2308_v21 }
  0x26   : > { %634 = vst.msk [vmem:[#allocation2 + $0xd1] sm:$0x7f] %vm625_vm3, %v2308_v21  ;;  %635 = vst.msk [vmem:[#allocation2 + $0xe9] sm:$0x7f] %vm625_vm3, %v2308_v21 }
  0x28   : > { %2074 = vmatmul.mubr.msk.f32.gmra.mxu0 %vm323_vm1, %v300_v6 }
  0x29   : > { %2076 = vmatprep.mubr.msk.f32.mxu0 %vm323_vm1, %v301_v7 }
  0x2c   : > { %2077 = vmatmul.mubr.msk.f32.gmra.mxu0 %vm323_vm1, %v302_v8 }
  0x2d   : > { %2079 = vmatprep.mubr.msk.f32.mxu0 %vm323_vm1, %v303_v9 }
  0x30   : > { %2080 = vmatmul.mubr.msk.f32.gmra.mxu0 %vm323_vm1, %v304_v10 }
  0x31   : > { %2082 = vmatprep.mubr.msk.f32.mxu0 %vm323_vm1, %v305_v11 }
  0x34   : > { %2083 = vmatmul.mubr.msk.f32.gmra.mxu0 %vm323_vm1, %v306_v12 }
  0x35   : > { %2085 = vmatprep.mubr.msk.f32.mxu0 %vm323_vm1, %v307_v13 }
  0x38   : > { %2086 = vmatmul.mubr.msk.f32.gmra.mxu0 %vm323_vm1, %v308_v14 }
  0x39   : > { %2088 = vmatprep.mubr.msk.f32.mxu0 %vm323_vm1, %v309_v15 }
  0x3c   : > { %2089 = vmatmul.mubr.msk.f32.gmra.mxu0 %vm323_vm1, %v310_v16 }
  0x3d   : > { %2091 = vmatprep.mubr.msk.f32.mxu0 %vm323_vm1, %v311_v17 }
  0x40   : > { %2092 = vmatmul.mubr.msk.f32.gmra.mxu0 %vm323_vm1, %v312_v18 }
  0x41   : > { %2094 = vmatprep.mubr.msk.f32.mxu0 %vm323_vm1, %v313_v19 }
  0x44   : > { %2095 = vmatmul.mubr.msk.f32.gmra.mxu0 %vm323_vm1, %v314_v20 }
  0xe0   : > { %v2069_v23 = vpop.f32.mrf.mxu0 }
  0xe1   : > { %v460_v24 = vadd.f32 %v2069_v23, %v2495_v22 }
  0xe2   : > { %v454_v25 = vpop.f32.mrf.mxu0 }
  0xe3   : > { %v554_v26 = vmax.f32 %v460_v24, 0.0  ;;  %v455_v27 = vadd.f32 %v2495_v22, %v454_v25 }
  0xe4   : > { %v2072_v28 = vpop.f32.mrf.mxu0 }
  0xe5   : > { %v574_v29 = vmin.f32 %v554_v26, 6.0  ;;  %v553_v30 = vmax.f32 %v455_v27, 0.0  ;;  %v470_v31 = vadd.f32 %v2072_v28, %v2495_v22 }
  0xe6   : > { %v464_v32 = vpop.f32.mrf.mxu0 }
  0xe7   : > { %595 = vst.msk [vmem:[#allocation2 + $0x9] sm:$0xff] %vm593_vm4, %v574_v29  ;;  %v573_v33 = vmin.f32 %v553_v30, 6.0  ;;  %v556_v34 = vmax.f32 %v470_v31, 0.0  ;;  %v465_v35 = vadd.f32 %v2495_v22, %v464_v32 }
  0xe8   : > { %v2075_v36 = vpop.f32.mrf.mxu0 }
  0xe9   : > { %594 = vst.msk [vmem:[#allocation2 + $0x1] sm:$0xff] %vm593_vm4, %v573_v33  ;;  %v576_v37 = vmin.f32 %v556_v34, 6.0  ;;  %v555_v38 = vmax.f32 %v465_v35, 0.0  ;;  %v480_v39 = vadd.f32 %v2075_v36, %v2495_v22 }
  0xea   : > { %v474_v40 = vpop.f32.mrf.mxu0 }
  0xeb   : > { %597 = vst.msk [vmem:[#allocation2 + $0x21] sm:$0xff] %vm593_vm4, %v576_v37  ;;  %v575_v41 = vmin.f32 %v555_v38, 6.0  ;;  %v558_v42 = vmax.f32 %v480_v39, 0.0  ;;  %v475_v43 = vadd.f32 %v2495_v22, %v474_v40 }
  0xec   : > { %v2078_v44 = vpop.f32.mrf.mxu0 }
  0xed   : > { %596 = vst.msk [vmem:[#allocation2 + $0x19] sm:$0xff] %vm593_vm4, %v575_v41  ;;  %v578_v45 = vmin.f32 %v558_v42, 6.0  ;;  %v557_v46 = vmax.f32 %v475_v43, 0.0  ;;  %v490_v47 = vadd.f32 %v2078_v44, %v2495_v22 }
  0xee   : > { %v484_v48 = vpop.f32.mrf.mxu0 }
  0xef   : > { %599 = vst.msk [vmem:[#allocation2 + $0x39] sm:$0xff] %vm593_vm4, %v578_v45  ;;  %v577_v49 = vmin.f32 %v557_v46, 6.0  ;;  %v560_v50 = vmax.f32 %v490_v47, 0.0  ;;  %v485_v51 = vadd.f32 %v2495_v22, %v484_v48 }
  0xf0   : > { %v2081_v52 = vpop.f32.mrf.mxu0 }
  0xf1   : > { %598 = vst.msk [vmem:[#allocation2 + $0x31] sm:$0xff] %vm593_vm4, %v577_v49  ;;  %v580_v53 = vmin.f32 %v560_v50, 6.0  ;;  %v559_v54 = vmax.f32 %v485_v51, 0.0  ;;  %v500_v55 = vadd.f32 %v2081_v52, %v2495_v22 }
  0xf2   : > { %v494_v56 = vpop.f32.mrf.mxu0 }
  0xf3   : > { %601 = vst.msk [vmem:[#allocation2 + $0x51] sm:$0xff] %vm593_vm4, %v580_v53  ;;  %v579_v57 = vmin.f32 %v559_v54, 6.0  ;;  %v562_v58 = vmax.f32 %v500_v55, 0.0  ;;  %v495_v59 = vadd.f32 %v2495_v22, %v494_v56 }
  0xf4   : > { %v2084_v60 = vpop.f32.mrf.mxu0 }
  0xf5   : > { %600 = vst.msk [vmem:[#allocation2 + $0x49] sm:$0xff] %vm593_vm4, %v579_v57  ;;  %v582_v61 = vmin.f32 %v562_v58, 6.0  ;;  %v561_v62 = vmax.f32 %v495_v59, 0.0  ;;  %v510_v63 = vadd.f32 %v2084_v60, %v2495_v22 }
  0xf6   : > { %v504_v0 = vpop.f32.mrf.mxu0 }
  0xf7   : > { %603 = vst.msk [vmem:[#allocation2 + $0x69] sm:$0xff] %vm593_vm4, %v582_v61  ;;  %v581_v1 = vmin.f32 %v561_v62, 6.0  ;;  %v564_v2 = vmax.f32 %v510_v63, 0.0  ;;  %v505_v3 = vadd.f32 %v2495_v22, %v504_v0 }
  0xf8   : > { %v2087_v4 = vpop.f32.mrf.mxu0 }
  0xf9   : > { %602 = vst.msk [vmem:[#allocation2 + $0x61] sm:$0xff] %vm593_vm4, %v581_v1  ;;  %v584_v5 = vmin.f32 %v564_v2, 6.0  ;;  %v563_v6 = vmax.f32 %v505_v3, 0.0  ;;  %v520_v7 = vadd.f32 %v2087_v4, %v2495_v22 }
  0xfa   : > { %v514_v8 = vpop.f32.mrf.mxu0 }
  0xfb   : > { %605 = vst.msk [vmem:[#allocation2 + $0x81] sm:$0xff] %vm593_vm4, %v584_v5  ;;  %v583_v9 = vmin.f32 %v563_v6, 6.0  ;;  %v566_v10 = vmax.f32 %v520_v7, 0.0  ;;  %v515_v11 = vadd.f32 %v2495_v22, %v514_v8 }
  0xfc   : > { %v2090_v12 = vpop.f32.mrf.mxu0 }
  0xfd   : > { %604 = vst.msk [vmem:[#allocation2 + $0x79] sm:$0xff] %vm593_vm4, %v583_v9  ;;  %v586_v13 = vmin.f32 %v566_v10, 6.0  ;;  %v565_v14 = vmax.f32 %v515_v11, 0.0  ;;  %v530_v15 = vadd.f32 %v2090_v12, %v2495_v22 }
  0xfe   : > { %v524_v16 = vpop.f32.mrf.mxu0 }
  0xff   : > { %607 = vst.msk [vmem:[#allocation2 + $0x99] sm:$0xff] %vm593_vm4, %v586_v13  ;;  %v585_v17 = vmin.f32 %v565_v14, 6.0  ;;  %v568_v18 = vmax.f32 %v530_v15, 0.0  ;;  %v525_v19 = vadd.f32 %v2495_v22, %v524_v16 }
 0x100   : > { %v2093_v20 = vpop.f32.mrf.mxu0 }
 0x101   : > { %606 = vst.msk [vmem:[#allocation2 + $0x91] sm:$0xff] %vm593_vm4, %v585_v17  ;;  %v588_v21 = vmin.f32 %v568_v18, 6.0  ;;  %v567_v23 = vmax.f32 %v525_v19, 0.0  ;;  %v540_v24 = vadd.f32 %v2093_v20, %v2495_v22 }
 0x102   : > { %v534_v25 = vpop.f32.mrf.mxu0 }
 0x103   : > { %609 = vst.msk [vmem:[#allocation2 + $0xb1] sm:$0xff] %vm593_vm4, %v588_v21  ;;  %v587_v26 = vmin.f32 %v567_v23, 6.0  ;;  %v570_v27 = vmax.f32 %v540_v24, 0.0  ;;  %v535_v28 = vadd.f32 %v2495_v22, %v534_v25 }
 0x104   : > { %v2096_v29 = vpop.f32.mrf.mxu0 }
 0x105   : > { %608 = vst.msk [vmem:[#allocation2 + $0xa9] sm:$0xff] %vm593_vm4, %v587_v26  ;;  %v590_v30 = vmin.f32 %v570_v27, 6.0  ;;  %v569_v31 = vmax.f32 %v535_v28, 0.0  ;;  %v550_v32 = vadd.f32 %v2096_v29, %v2495_v22 }
 0x106   : > { %v544_v33 = vpop.f32.mrf.mxu0 }
 0x107   : > { %611 = vst.msk [vmem:[#allocation2 + $0xc9] sm:$0xff] %vm593_vm4, %v590_v30  ;;  %v589_v34 = vmin.f32 %v569_v31, 6.0  ;;  %v572_v35 = vmax.f32 %v550_v32, 0.0  ;;  %v545_v36 = vadd.f32 %v2495_v22, %v544_v33 }
 0x109   : > { %610 = vst.msk [vmem:[#allocation2 + $0xc1] sm:$0xff] %vm593_vm4, %v589_v34  ;;  %v592_v37 = vmin.f32 %v572_v35, 6.0  ;;  %v571_v38 = vmax.f32 %v545_v36, 0.0  ;;  %639 = sbr.rel (%p1987_p13) target bundleno = 272 (0x110), region = 52 }
 0x10b   : > { %613 = vst.msk [vmem:[#allocation2 + $0xe1] sm:$0xff] %vm593_vm4, %v592_v37  ;;  %v591_v39 = vmin.f32 %v571_v38, 6.0 }
 0x10d   : > { %612 = vst.msk [vmem:[#allocation2 + $0xd9] sm:$0xff] %vm593_vm4, %v591_v39 }
 0x10e   : > { %v2309_v40 = vmov 0.0  }
 0x10f   : > { %640 = vst.msk [vmem:[#allocation2 + $0x1] sm:$0xff] %vm593_vm4, %v2309_v40  ;;  %641 = vst.msk [vmem:[#allocation2 + $0x9] sm:$0xff] %vm593_vm4, %v2309_v40 }
 0x110 PF: > { %s3398_s10 = sshll.u32 %s2290_s27, 3 }
 0x111   : > { %s642_s13 = sadd.s32 10, %s3398_s10 }
 0x112   : > { %p1988_p0 = scmp.ne.s32.totalorder %s642_s13, 18 }
 0x114   : > { %646 = sbr.rel (%p1988_p0) target bundleno = 283 (0x11b), region = 56 }
 0x119   : > { %v2310_v22 = vmov 0.0  }
 0x11a   : > { %648 = vst.msk [vmem:[#allocation2 + $0xd9] sm:$0xff] %vm593_vm4, %v2310_v22  ;;  %649 = vst.msk [vmem:[#allocation2 + $0xe1] sm:$0xff] %vm593_vm4, %v2310_v22 }
 0x11b PF: > { %v1644_v41 = vld [vmem:[%s3390_s5 + $0x10] sm:$0xff]  ;;  %v1643_v42 = vld [vmem:[%s3390_s5 + $0x8] sm:$0xff]  ;;  %v1642_v43 = vld [vmem:[%s3390_s5] sm:$0xff]  ;;  %vm764_vm5 = vcmask 1046528   ;;  %vm890_vm6 = vcmask 1045504   ;;  %s2024_s18 = sshll.u32 %s2290_s27, 4 }
 0x11c   : > { %2097 = vmatprep.subr.mxu1 %v1644_v41  ;;  %v650_v44 = vld [vmem:[#allocation2] sm:$0xff]  ;;  %v651_v45 = vld [vmem:[#allocation2 + $0x8] sm:$0xff]  ;;  %v2573_v50 = vld [vmem:[#allocation2 + $0x18] sm:$0xff]  ;;  %s2019_s12 = sshll.u32 %s2294_s28, 5  ;;  %s1878_s10 = sshll.u32 %s2538_s22, 4  ;;  %s3328_s10 = int_to_ptr.vmem [resolvable:$true] %s1878_s10 }
 0x11d   : > { %v2560_v46 = vld [vmem:[%s3388_s3] ss:$0 sm:$0xff]  ;;  %2098 = vmatpush3.msra.mxu1 %v1644_v41  ;;  %v2566_v48 = vld [vmem:[%s3388_s3 + $0x1] ss:$0 sm:$0xff]  ;;  %v2571_v49 = vld [vmem:[%s3388_s3 + $0x2] ss:$0 sm:$0xff]  ;;  %s1875_s21 = sadd.s32 %s2024_s18, %s2019_s12 }
 0x11e   : > { %v679_v47 = vmul.f32 %v2560_v46, %v650_v44  ;;  %v2576_v51 = vmul.f32 %v2560_v46, %v651_v45  ;;  %2099 = vmatprep.subr.mxu1 %v1643_v42  ;;  %v716_v52 = vmul.f32 %v2566_v48, %v650_v44  ;;  %v717_v53 = vmul.f32 %v2566_v48, %v651_v45  ;;  %v2582_v56 = vld [vmem:[#allocation2 + $0x20] sm:$0xff]  ;;  %v2605_v63 = vld [vmem:[#allocation2 + $0x30] sm:$0xff]  ;;  %v2628_v11 = vld [vmem:[%s3388_s3 + $0x8] ss:$0 sm:$0xff]  ;;  %s2020_s23 = sshll.u32 %s1875_s21, 7  ;;  %s3334_s27 = scalar_lea.sflag [#allocation4], %s283_s20 }
 0x11f   : > { %v842_v54 = vmul.f32 %v2571_v49, %v650_v44  ;;  %v843_v55 = vmul.f32 %v2571_v49, %v651_v45  ;;  %v2587_v57 = vld [vmem:[%s3388_s3 + $0x3] ss:$0 sm:$0xff]  ;;  %v2592_v58 = vld [vmem:[%s3388_s3 + $0x4] ss:$0 sm:$0xff]  ;;  %2100 = vmatpush3.msra.mxu1 %v1643_v42  ;;  %v2603_v62 = vld [vmem:[%s3388_s3 + $0x5] ss:$0 sm:$0xff]  ;;  %v1467_v25 = vmul.f32 %v2628_v11, %v2605_v63  ;;  %s3326_s16 = scalar_lea.hbm %s3392_s7, %s2020_s23 }
 0x120   : > { %v993_v59 = vmul.f32 %v2587_v57, %v2573_v50  ;;  %v1030_v60 = vmul.f32 %v2592_v58, %v2573_v50  ;;  %v1031_v61 = vmul.f32 %v2592_v58, %v2582_v56  ;;  %v2609_v0 = vmul.f32 %v2587_v57, %v2582_v56  ;;  %2101 = vmatprep.subr.mxu1 %v1642_v43  ;;  %v2614_v5 = vld [vmem:[%s3388_s3 + $0x6] ss:$0 sm:$0xff]  ;;  %v2623_v10 = vld [vmem:[%s3388_s3 + $0x7] ss:$0 sm:$0xff]  ;;  %v652_v16 = vld [vmem:[#allocation2 + $0x10] sm:$0xff]  ;;  %s2214_s28 = scalar_lea.vmem %s3328_s10, 2048 }
 0x121   : > { %v765_v1 = vrot.slane %v716_v52, 1  ;;  %v766_v2 = vrot.slane %v717_v53, 1  ;;  %v891_v3 = vrot.slane %v842_v54, 2  ;;  %v892_v4 = vrot.slane %v843_v55, 2  ;;  %2102 = vmatpush3.msra.mxu1 %v1642_v43  ;;  %v2637_v21 = vld [vmem:[#allocation2 + $0x38] sm:$0xff]  ;;  %v2648_v31 = vld [vmem:[#allocation2 + $0x28] sm:$0xff]  ;;  %p2215_p1 = scmp.ne.s32.totalorder %s3328_s10, %s2214_s28 }
 0x122   : > { %v1078_v6 = vrot.slane %v1030_v60, 1  ;;  %v1079_v7 = vrot.slane %v1031_v61, 1  ;;  %v1155_v8 = vmul.f32 %v2603_v62, %v2573_v50  ;;  %v1156_v9 = vmul.f32 %v2603_v62, %v2582_v56  ;;  %v2660_v52 = vld [vmem:[#allocation2 + $0x40] sm:$0xff]  ;;  %s2311_s17 = smov [#allocation3]  }
 0x123   : > { %v767_v12 = vsel %vm764_vm5, %v765_v1, %v766_v2  ;;  %v893_v13 = vsel %vm890_vm6, %v891_v3, %v892_v4  ;;  %v1305_v14 = vmul.f32 %v2614_v5, %v2605_v63  ;;  %v1342_v15 = vmul.f32 %v2623_v10, %v2605_v63  ;;  %p2216_p2 = pnand %p2215_p1, %p2405_p3  ;;  %s2218_s18 = sshll.u32 %s2311_s17, 4  ;;  %s2219_s18 = int_to_ptr.vmem [resolvable:$false] %s2218_s18 }
 0x124   : > { %v821_v17 = vadd.f32 %v767_v12, %v679_v47  ;;  %v1080_v18 = vsel %vm764_vm5, %v1078_v6, %v1079_v7  ;;  %v1203_v19 = vrot.slane %v1155_v8, 2  ;;  %v1204_v20 = vrot.slane %v1156_v9, 2  ;;  %s2220_s12 = scalar_lea.vmem %s2219_s18, 4096  ;;  %p2221_p5 = scmp.lt.s32.totalorder %s3328_s10, %s2219_s18 }
 0x125   : > { %v1343_v23 = vmul.f32 %v2623_v10, %v2637_v21  ;;  %v1390_v24 = vrot.slane %v1342_v15, 1  ;;  %v1468_v26 = vmul.f32 %v2628_v11, %v2637_v21  ;;  %v718_v29 = vmul.f32 %v2566_v48, %v652_v16  ;;  %p2217_p4 = pneg %p2216_p2  ;;  %p2222_p6 = scmp.lt.s32.totalorder %s2220_s12, %s2214_s28 }
 0x126   : > { %v947_v27 = vadd.f32 %v893_v13, %v821_v17  ;;  %v1205_v28 = vsel %vm890_vm6, %v1203_v19, %v1204_v20  ;;  %v844_v30 = vmul.f32 %v2571_v49, %v652_v16  ;;  %v1515_v33 = vrot.slane %v1467_v25, 2 }
 0x127   : > { %v1391_v32 = vrot.slane %v1343_v23, 1  ;;  %v1516_v34 = vrot.slane %v1468_v26, 2  ;;  %v1032_v35 = vmul.f32 %v2592_v58, %v2648_v31  ;;  %v768_v37 = vrot.slane %v718_v29, 1  ;;  %p2223_p7 = por %p2222_p6, %p2221_p5 }
 0x128   : > { %v1009_v36 = vadd.f32 %v993_v59, %v947_v27  ;;  %v894_v38 = vrot.slane %v844_v30, 2  ;;  %v1157_v39 = vmul.f32 %v2603_v62, %v2648_v31  ;;  %v1306_v42 = vmul.f32 %v2614_v5, %v2637_v21 }
 0x129   : > { %v1392_v40 = vsel %vm764_vm5, %v1390_v24, %v1391_v32  ;;  %v1517_v22 = vsel %vm890_vm6, %v1515_v33, %v1516_v34  ;;  %v1081_v41 = vrot.slane %v1032_v35, 1  ;;  %v769_v44 = vsel %vm764_vm5, %v766_v2, %v768_v37  ;;  %v2708_v35 = vld [vmem:[#allocation2 + $0x48] sm:$0xff]  ;;  %p2224_p9 = pnand %p2223_p7, %p2217_p4 }
 0x12a   : > { %v1134_v43 = vadd.f32 %v1080_v18, %v1009_v36  ;;  %v895_v45 = vsel %vm890_vm6, %v892_v4, %v894_v38  ;;  %v1206_v47 = vrot.slane %v1157_v39, 2  ;;  %v822_v53 = vadd.f32 %v769_v44, %v2576_v51 }
 0x12b   : > { %v1082_v54 = vsel %vm764_vm5, %v1079_v7, %v1081_v41  ;;  %v1344_v55 = vmul.f32 %v2623_v10, %v2660_v52  ;;  %v1469_v59 = vmul.f32 %v2628_v11, %v2660_v52  ;;  %v681_v1 = vmul.f32 %v2560_v46, %v2573_v50 }
 0x12c   : > { %v1259_v60 = vadd.f32 %v1205_v28, %v1134_v43  ;;  %v1207_v61 = vsel %vm890_vm6, %v1204_v20, %v1206_v47  ;;  %v719_v2 = vmul.f32 %v2566_v48, %v2573_v50  ;;  %v948_v3 = vadd.f32 %v895_v45, %v822_v53  ;;  %v2714_v43 = vld [vmem:[#allocation2 + $0x50] sm:$0xff] }
 0x12d   : > { %v1393_v4 = vrot.slane %v1344_v55, 1  ;;  %v1518_v51 = vrot.slane %v1469_v59, 2  ;;  %v2675_v6 = vmul.f32 %v2566_v48, %v2582_v56  ;;  %v845_v9 = vmul.f32 %v2571_v49, %v2573_v50  ;;  %v2693_v50 = vld [vmem:[%s3389_s4] ss:$0 sm:$0xff] }
 0x12e   : > { %v1321_v7 = vadd.f32 %v1305_v14, %v1259_v60  ;;  %v770_v8 = vrot.slane %v719_v2, 1  ;;  %v2681_v12 = vmul.f32 %v2571_v49, %v2582_v56  ;;  %v1010_v13 = vadd.f32 %v2609_v0, %v948_v3 }
 0x12f   : > { %v1394_v15 = vsel %vm764_vm5, %v1391_v32, %v1393_v4  ;;  %v1519_v16 = vsel %vm890_vm6, %v1516_v34, %v1518_v51  ;;  %v771_v17 = vrot.slane %v2675_v6, 1  ;;  %v896_v19 = vrot.slane %v845_v9, 2 }
 0x130   : > { %v1446_v18 = vadd.f32 %v1392_v40, %v1321_v7  ;;  %v897_v14 = vrot.slane %v2681_v12, 2  ;;  %v995_v20 = vmul.f32 %v2587_v57, %v2605_v63  ;;  %v1135_v23 = vadd.f32 %v1082_v54, %v1010_v13 }
 0x131   : > { %v772_v0 = vsel %vm764_vm5, %v770_v8, %v771_v17  ;;  %v1033_v24 = vmul.f32 %v2592_v58, %v2605_v63  ;;  %v2700_v25 = vmul.f32 %v2592_v58, %v2637_v21  ;;  %v1158_v29 = vmul.f32 %v2603_v62, %v2605_v63 }
 0x132   : > { %v1571_v26 = vadd.f32 %v1517_v22, %v1446_v18  ;;  %v823_v27 = vadd.f32 %v772_v0, %v681_v1  ;;  %v898_v28 = vsel %vm890_vm6, %v896_v19, %v897_v14  ;;  %v1260_v30 = vadd.f32 %v1207_v61, %v1135_v23  ;;  %v2746_v0 = vld [vmem:[#allocation2 + $0x58] sm:$0xff] }
 0x133   : > { %v1083_v32 = vrot.slane %v1033_v24, 1  ;;  %v1084_v33 = vrot.slane %v2700_v25, 1  ;;  %v1159_v34 = vmul.f32 %v2603_v62, %v2637_v21  ;;  %v1208_v38 = vrot.slane %v1158_v29, 2 }
 0x134   : > { %v1594_v36 = vadd.f32 %v2693_v50, %v1571_v26  ;;  %v949_v37 = vadd.f32 %v898_v28, %v823_v27  ;;  %v1307_v39 = vmul.f32 %v2614_v5, %v2708_v35  ;;  %v1322_v40 = vadd.f32 %v1306_v42, %v1260_v30 }
 0x135   : > { %v1085_v22 = vsel %vm764_vm5, %v1083_v32, %v1084_v33  ;;  %v1209_v41 = vrot.slane %v1159_v34, 2  ;;  %v1345_v44 = vmul.f32 %v2623_v10, %v2708_v35  ;;  %v1346_v53 = vmul.f32 %v2623_v10, %v2714_v43 }
 0x136   : > { %v1610_v45 = vmax.f32 %v1594_v36, 0.0  ;;  %v1011_v47 = vadd.f32 %v995_v20, %v949_v37  ;;  %v1470_v54 = vmul.f32 %v2628_v11, %v2708_v35  ;;  %v1447_v55 = vadd.f32 %v1394_v15, %v1322_v40 }
 0x137   : > { %v1210_v59 = vsel %vm890_vm6, %v1208_v38, %v1209_v41  ;;  %v1395_v42 = vrot.slane %v1345_v44, 1  ;;  %v2725_v60 = vmul.f32 %v2628_v11, %v2714_v43  ;;  %v1396_v2 = vrot.slane %v1346_v53, 1 }
 0x138   : > { %v1626_v61 = vmin.f32 %v1610_v45, 6.0  ;;  %v1136_v1 = vadd.f32 %v1085_v22, %v1011_v47  ;;  %v1520_v3 = vrot.slane %v1470_v54, 2  ;;  %v1572_v4 = vadd.f32 %v1519_v16, %v1447_v55 }
 0x139   : > { %v1521_v51 = vrot.slane %v2725_v60, 2  ;;  %v721_v6 = vmul.f32 %v2566_v48, %v2648_v31  ;;  %v1397_v8 = vsel %vm764_vm5, %v1395_v42, %v1396_v2  ;;  %v682_v9 = vmul.f32 %v2560_v46, %v2582_v56 }
 0x13a   : > { %2103 = vmatprep.mubr.msk.f32.mxu1 %vm593_vm4, %v1626_v61  ;;  %v1261_v7 = vadd.f32 %v1210_v59, %v1136_v1  ;;  %v847_v12 = vmul.f32 %v2571_v49, %v2648_v31  ;;  %v1595_v13 = vadd.f32 %v2693_v50, %v1572_v4  ;;  %v996_v16 = vmul.f32 %v2587_v57, %v2637_v21 }
 0x13b   : > { %v773_v15 = vrot.slane %v721_v6, 1  ;;  %v1035_v18 = vmul.f32 %v2592_v58, %v2660_v52  ;;  %v1522_v20 = vsel %vm890_vm6, %v1520_v3, %v1521_v51  ;;  %v1160_v56 = vmul.f32 %v2603_v62, %v2660_v52 }
 0x13c   : > { %v1323_v19 = vadd.f32 %v1307_v39, %v1261_v7  ;;  %v899_v23 = vrot.slane %v847_v12, 2  ;;  %v1611_v31 = vmax.f32 %v1595_v13, 0.0  ;;  %v1347_v26 = vmul.f32 %v2623_v10, %v2746_v0 }
 0x13d   : > { %v774_v24 = vsel %vm764_vm5, %v771_v17, %v773_v15  ;;  %v1086_v25 = vrot.slane %v1035_v18, 1  ;;  %v1211_v30 = vrot.slane %v1160_v56, 2  ;;  %v1308_v34 = vmul.f32 %v2614_v5, %v2714_v43 }
 0x13e   : > { %v1448_v27 = vadd.f32 %v1397_v8, %v1323_v19  ;;  %v824_v28 = vadd.f32 %v774_v24, %v682_v9  ;;  %v900_v29 = vsel %vm890_vm6, %v897_v14, %v899_v23  ;;  %v1627_v32 = vmin.f32 %v1611_v31, 6.0  ;;  %v2795_v24 = vld [vmem:[#allocation2 + $0x68] sm:$0xff] }
 0x13f   : > { %v1398_v36 = vrot.slane %v1347_v26, 1  ;;  %v1472_v37 = vmul.f32 %v2628_v11, %v2746_v0  ;;  %v1087_v17 = vsel %vm764_vm5, %v1084_v33, %v1086_v25  ;;  %v1212_v40 = vsel %vm890_vm6, %v1209_v41, %v1211_v30 }
 0x140   : > { %v1573_v38 = vadd.f32 %v1522_v20, %v1448_v27  ;;  %v950_v39 = vadd.f32 %v900_v29, %v824_v28  ;;  %2104 = vmatmul.mubr.msk.f32.vlgmr.msra.gmra.mxu1 %vm593_vm4, %v1627_v32  ;;  %v683_v14 = vmul.f32 %v2560_v46, %v2605_v63  ;;  %v722_v44 = vmul.f32 %v2566_v48, %v2605_v63  ;;  %v2789_v20 = vld [vmem:[#allocation2 + $0x60] sm:$0xff] }
 0x141   : > { %v1399_v22 = vsel %vm764_vm5, %v1396_v2, %v1398_v36  ;;  %v2766_v45 = vmul.f32 %v2566_v48, %v2637_v21  ;;  %v848_v33 = vmul.f32 %v2571_v49, %v2605_v63  ;;  %v2773_v41 = vmul.f32 %v2571_v49, %v2637_v21 }
 0x142   : > { %v1596_v47 = vadd.f32 %v2693_v50, %v1573_v38  ;;  %v1012_v53 = vadd.f32 %v996_v16, %v950_v39  ;;  %v1523_v54 = vrot.slane %v1472_v37, 2  ;;  %v775_v55 = vrot.slane %v722_v44, 1 }
 0x143   : > { %v776_v59 = vrot.slane %v2766_v45, 1  ;;  %v997_v42 = vmul.f32 %v2587_v57, %v2708_v35  ;;  %v901_v2 = vrot.slane %v848_v33, 2  ;;  %v902_v3 = vrot.slane %v2773_v41, 2 }
 0x144   : > { %v1612_v61 = vmax.f32 %v1596_v47, 0.0  ;;  %v1137_v1 = vadd.f32 %v1087_v17, %v1012_v53  ;;  %v1036_v63 = vmul.f32 %v2592_v58, %v2708_v35  ;;  %v1037_v6 = vmul.f32 %v2592_v58, %v2714_v43 }
 0x145   : > { %v777_v4 = vsel %vm764_vm5, %v775_v55, %v776_v59  ;;  %v1161_v7 = vmul.f32 %v2603_v62, %v2708_v35  ;;  %v903_v13 = vsel %vm890_vm6, %v901_v2, %v902_v3  ;;  %v1162_v18 = vmul.f32 %v2603_v62, %v2714_v43 }
 0x146   : > { %v1628_v8 = vmin.f32 %v1612_v61, 6.0  ;;  %v1262_v9 = vadd.f32 %v1212_v40, %v1137_v1  ;;  %v825_v12 = vadd.f32 %v777_v4, %v683_v14  ;;  %v1088_v15 = vrot.slane %v1036_v63, 1 }
 0x147   : > { %v1089_v16 = vrot.slane %v1037_v6, 1  ;;  %v1213_v19 = vrot.slane %v1161_v7, 2  ;;  %v1524_v56 = vsel %vm890_vm6, %v1521_v51, %v1523_v54  ;;  %v1348_v25 = vmul.f32 %v2623_v10, %v2789_v20 }
 0x148   : > { %2106 = vmatprep.mubr.msk.f32.mxu1 %vm593_vm4, %v1628_v8  ;;  %v1324_v23 = vadd.f32 %v1308_v34, %v1262_v9  ;;  %v951_v31 = vadd.f32 %v903_v13, %v825_v12  ;;  %v1214_v27 = vrot.slane %v1162_v18, 2  ;;  %v1349_v28 = vmul.f32 %v2623_v10, %v2795_v24 }
 0x149   : > { %v1090_v26 = vsel %vm764_vm5, %v1088_v15, %v1089_v16  ;;  %v1473_v29 = vmul.f32 %v2628_v11, %v2789_v20  ;;  %v1400_v60 = vrot.slane %v1348_v25, 1  ;;  %v2806_v51 = vmul.f32 %v2628_v11, %v2795_v24 }
 0x14a   : > { %v1449_v30 = vadd.f32 %v1399_v22, %v1324_v23  ;;  %v1013_v32 = vadd.f32 %v997_v42, %v951_v31  ;;  %v1215_v34 = vsel %vm890_vm6, %v1213_v19, %v1214_v27  ;;  %v1309_v36 = vmul.f32 %v2614_v5, %v2789_v20 }
 0x14b   : > { %v1401_v37 = vrot.slane %v1349_v28, 1  ;;  %v1525_v38 = vrot.slane %v1473_v29, 2  ;;  %v1526_v40 = vrot.slane %v2806_v51, 2  ;;  %v724_v22 = vmul.f32 %v2566_v48, %v2660_v52 }
 0x14c   : > { %v1574_v39 = vadd.f32 %v1524_v56, %v1449_v30  ;;  %v1138_v17 = vadd.f32 %v1090_v26, %v1013_v32  ;;  %v684_v44 = vmul.f32 %v2560_v46, %v2637_v21  ;;  %v850_v45 = vmul.f32 %v2571_v49, %v2660_v52  ;;  %v2829_v52 = vld [vmem:[#allocation2 + $0x70] sm:$0xff] }
 0x14d   : > { %v1402_v14 = vsel %vm764_vm5, %v1400_v60, %v1401_v37  ;;  %v1038_v47 = vmul.f32 %v2592_v58, %v2746_v0  ;;  %v778_v41 = vrot.slane %v724_v22, 1  ;;  %v998_v54 = vmul.f32 %v2587_v57, %v2714_v43 }
 0x14e   : > { %v1597_v53 = vadd.f32 %v2693_v50, %v1574_v39  ;;  %v1263_v33 = vadd.f32 %v1215_v34, %v1138_v17  ;;  %v1527_v55 = vsel %vm890_vm6, %v1525_v38, %v1526_v40  ;;  %v904_v42 = vrot.slane %v850_v45, 2 }
 0x14f   : > { %v1091_v61 = vrot.slane %v1038_v47, 1  ;;  %v1163_v21 = vmul.f32 %v2603_v62, %v2746_v0  ;;  %v779_v4 = vsel %vm764_vm5, %v776_v59, %v778_v41  ;;  %v1350_v63 = vmul.f32 %v2623_v10, %v2829_v52 }
 0x150   : > { %v1613_v1 = vmax.f32 %v1597_v53, 0.0  ;;  %v1325_v2 = vadd.f32 %v1309_v36, %v1263_v33  ;;  %v826_v6 = vadd.f32 %v779_v4, %v684_v44  ;;  %v905_v7 = vsel %vm890_vm6, %v902_v3, %v904_v42  ;;  %v2872_v42 = vld [vmem:[#allocation2 + $0x78] sm:$0xff] }
 0x151   : > { %v1216_v8 = vrot.slane %v1163_v21, 2  ;;  %v1310_v9 = vmul.f32 %v2614_v5, %v2795_v24  ;;  %v1403_v15 = vrot.slane %v1350_v63, 1  ;;  %v1475_v18 = vmul.f32 %v2628_v11, %v2829_v52 }
 0x152   : > { %v1629_v12 = vmin.f32 %v1613_v1, 6.0  ;;  %v1450_v13 = vadd.f32 %v1402_v14, %v1325_v2  ;;  %v952_v19 = vadd.f32 %v905_v7, %v826_v6  ;;  %v1092_v23 = vsel %vm764_vm5, %v1089_v16, %v1091_v61  ;;  %v2877_v2 = vld [vmem:[#allocation2 + $0x80] sm:$0xff] }
 0x153   : > { %v1217_v59 = vsel %vm890_vm6, %v1214_v27, %v1216_v8  ;;  %v725_v56 = vmul.f32 %v2566_v48, %v2708_v35  ;;  %v1404_v31 = vsel %vm764_vm5, %v1401_v37, %v1403_v15  ;;  %v685_v25 = vmul.f32 %v2560_v46, %v2708_v35 }
 0x154   : > { %2107 = vmatmul.mubr.msk.f32.gmra.mxu1 %vm593_vm4, %v1629_v12  ;;  %v1575_v3 = vadd.f32 %v1527_v55, %v1450_v13  ;;  %v2849_v26 = vmul.f32 %v2566_v48, %v2714_v43  ;;  %v1014_v28 = vadd.f32 %v998_v54, %v952_v19  ;;  %v851_v16 = vmul.f32 %v2571_v49, %v2708_v35 }
 0x155   : > { %v780_v29 = vrot.slane %v725_v56, 1  ;;  %v2855_v27 = vmul.f32 %v2571_v49, %v2714_v43  ;;  %v1528_v32 = vrot.slane %v1475_v18, 2  ;;  %v999_v34 = vmul.f32 %v2587_v57, %v2789_v20 }
 0x156   : > { %v1598_v30 = vadd.f32 %v2693_v50, %v1575_v3  ;;  %v781_v60 = vrot.slane %v2849_v26, 1  ;;  %v1139_v36 = vadd.f32 %v1092_v23, %v1014_v28  ;;  %v906_v37 = vrot.slane %v851_v16, 2 }
 0x157   : > { %v907_v38 = vrot.slane %v2855_v27, 2  ;;  %v1039_v39 = vmul.f32 %v2592_v58, %v2789_v20  ;;  %v1040_v22 = vmul.f32 %v2592_v58, %v2795_v24  ;;  %v1164_v14 = vmul.f32 %v2603_v62, %v2789_v20 }
 0x158   : > { %v1614_v35 = vmax.f32 %v1598_v30, 0.0  ;;  %v782_v17 = vsel %vm764_vm5, %v780_v29, %v781_v60  ;;  %v1264_v44 = vadd.f32 %v1217_v59, %v1139_v36  ;;  %v1165_v54 = vmul.f32 %v2603_v62, %v2795_v24 }
 0x159   : > { %v827_v45 = vadd.f32 %v782_v17, %v685_v25  ;;  %v908_v47 = vsel %vm890_vm6, %v906_v37, %v907_v38  ;;  %v1093_v53 = vrot.slane %v1039_v39, 1  ;;  %v1094_v41 = vrot.slane %v1040_v22, 1 }
 0x15a   : > { %v1630_v33 = vmin.f32 %v1614_v35, 6.0  ;;  %v1218_v55 = vrot.slane %v1164_v14, 2  ;;  %v1326_v61 = vadd.f32 %v1310_v9, %v1264_v44  ;;  %v1529_v21 = vsel %vm890_vm6, %v1526_v40, %v1528_v32 }
 0x15b   : > { %v953_v1 = vadd.f32 %v908_v47, %v827_v45  ;;  %v1351_v4 = vmul.f32 %v2623_v10, %v2872_v42  ;;  %v1095_v63 = vsel %vm764_vm5, %v1093_v53, %v1094_v41  ;;  %v1219_v6 = vrot.slane %v1165_v54, 2 }
 0x15c   : > { %2109 = vmatprep.mubr.msk.f32.mxu1 %vm593_vm4, %v1630_v33  ;;  %v1352_v7 = vmul.f32 %v2623_v10, %v2877_v2  ;;  %v1476_v8 = vmul.f32 %v2628_v11, %v2872_v42  ;;  %v1451_v51 = vadd.f32 %v1404_v31, %v1326_v61  ;;  %v2889_v12 = vmul.f32 %v2628_v11, %v2877_v2 }
 0x15d   : > { %v1015_v9 = vadd.f32 %v999_v34, %v953_v1  ;;  %v1405_v40 = vrot.slane %v1351_v4, 1  ;;  %v1220_v13 = vsel %vm890_vm6, %v1218_v55, %v1219_v6  ;;  %v1311_v15 = vmul.f32 %v2614_v5, %v2872_v42 }
 0x15e   : > { %v1406_v18 = vrot.slane %v1352_v7, 1  ;;  %v1530_v19 = vrot.slane %v1476_v8, 2  ;;  %v1576_v23 = vadd.f32 %v1529_v21, %v1451_v51  ;;  %v1531_v56 = vrot.slane %v2889_v12, 2 }
 0x15f   : > { %v1140_v59 = vadd.f32 %v1095_v63, %v1015_v9  ;;  %v727_v3 = vmul.f32 %v2566_v48, %v2746_v0  ;;  %v686_v25 = vmul.f32 %v2560_v46, %v2714_v43  ;;  %v853_v26 = vmul.f32 %v2571_v49, %v2746_v0  ;;  %v2912_v0 = vld [vmem:[#allocation2 + $0x88] sm:$0xff] }
 0x160   : > { %v1407_v31 = vsel %vm764_vm5, %v1405_v40, %v1406_v18  ;;  %v1041_v28 = vmul.f32 %v2592_v58, %v2829_v52  ;;  %v1599_v29 = vadd.f32 %v2693_v50, %v1576_v23  ;;  %v1000_v30 = vmul.f32 %v2587_v57, %v2795_v24 }
 0x161   : > { %v1265_v16 = vadd.f32 %v1220_v13, %v1140_v59  ;;  %v783_v27 = vrot.slane %v727_v3, 1  ;;  %v1532_v32 = vsel %vm890_vm6, %v1530_v19, %v1531_v56  ;;  %v909_v34 = vrot.slane %v853_v26, 2 }
 0x162   : > { %v1096_v36 = vrot.slane %v1041_v28, 1  ;;  %v1166_v43 = vmul.f32 %v2603_v62, %v2829_v52  ;;  %v1615_v37 = vmax.f32 %v1599_v29, 0.0  ;;  %v1353_v17 = vmul.f32 %v2623_v10, %v2912_v0 }
 0x163   : > { %v1327_v39 = vadd.f32 %v1311_v15, %v1265_v16  ;;  %v784_v35 = vsel %vm764_vm5, %v781_v60, %v783_v27  ;;  %v910_v14 = vsel %vm890_vm6, %v907_v38, %v909_v34  ;;  %v1312_v45 = vmul.f32 %v2614_v5, %v2877_v2  ;;  %v2955_v34 = vld [vmem:[#allocation2 + $0x90] sm:$0xff] }
 0x164   : > { %v828_v22 = vadd.f32 %v784_v35, %v686_v25  ;;  %v1221_v44 = vrot.slane %v1166_v43, 2  ;;  %v1631_v47 = vmin.f32 %v1615_v37, 6.0  ;;  %v1408_v33 = vrot.slane %v1353_v17, 1 }
 0x165   : > { %v1452_v53 = vadd.f32 %v1407_v31, %v1327_v39  ;;  %v1478_v54 = vmul.f32 %v2628_v11, %v2912_v0  ;;  %v1097_v61 = vsel %vm764_vm5, %v1094_v41, %v1096_v36  ;;  %v728_v21 = vmul.f32 %v2566_v48, %v2789_v20  ;;  %v2960_v39 = vld [vmem:[#allocation2 + $0x98] sm:$0xff] }
 0x166   : > { %v954_v55 = vadd.f32 %v910_v14, %v828_v22  ;;  %v1222_v60 = vsel %vm890_vm6, %v1219_v6, %v1221_v44  ;;  %2110 = vmatmul.mubr.msk.f32.gmra.mxu1 %vm593_vm4, %v1631_v47  ;;  %v1409_v1 = vsel %vm764_vm5, %v1406_v18, %v1408_v33  ;;  %v687_v4 = vmul.f32 %v2560_v46, %v2789_v20 }
 0x167   : > { %v1577_v38 = vadd.f32 %v1532_v32, %v1452_v53  ;;  %v2932_v63 = vmul.f32 %v2566_v48, %v2795_v24  ;;  %v785_v8 = vrot.slane %v728_v21, 1  ;;  %v854_v41 = vmul.f32 %v2571_v49, %v2789_v20 }
 0x168   : > { %v1016_v7 = vadd.f32 %v1000_v30, %v954_v55  ;;  %v2938_v6 = vmul.f32 %v2571_v49, %v2795_v24  ;;  %v1533_v9 = vrot.slane %v1478_v54, 2  ;;  %v1001_v13 = vmul.f32 %v2587_v57, %v2872_v42 }
 0x169   : > { %v1600_v51 = vadd.f32 %v2693_v50, %v1577_v38  ;;  %v786_v40 = vrot.slane %v2932_v63, 1  ;;  %v911_v18 = vrot.slane %v854_v41, 2  ;;  %v1042_v23 = vmul.f32 %v2592_v58, %v2872_v42 }
 0x16a   : > { %v1141_v15 = vadd.f32 %v1097_v61, %v1016_v7  ;;  %v912_v19 = vrot.slane %v2938_v6, 2  ;;  %v1043_v3 = vmul.f32 %v2592_v58, %v2877_v2  ;;  %v1167_v31 = vmul.f32 %v2603_v62, %v2872_v42 }
 0x16b   : > { %v1616_v20 = vmax.f32 %v1600_v51, 0.0  ;;  %v787_v59 = vsel %vm764_vm5, %v785_v8, %v786_v40  ;;  %v1098_v29 = vrot.slane %v1042_v23, 1  ;;  %v1168_v30 = vmul.f32 %v2603_v62, %v2877_v2 }
 0x16c   : > { %v1266_v25 = vadd.f32 %v1222_v60, %v1141_v15  ;;  %v829_v26 = vadd.f32 %v787_v59, %v687_v4  ;;  %v913_v28 = vsel %vm890_vm6, %v911_v18, %v912_v19  ;;  %v1099_v27 = vrot.slane %v1043_v3, 1 }
 0x16d   : > { %v1632_v16 = vmin.f32 %v1616_v20, 6.0  ;;  %v1223_v32 = vrot.slane %v1167_v31, 2  ;;  %v1534_v43 = vsel %vm890_vm6, %v1531_v56, %v1533_v9  ;;  %v1354_v35 = vmul.f32 %v2623_v10, %v2955_v34 }
 0x16e   : > { %v1328_v36 = vadd.f32 %v1312_v45, %v1266_v25  ;;  %v955_v37 = vadd.f32 %v913_v28, %v829_v26  ;;  %v1100_v17 = vsel %vm764_vm5, %v1098_v29, %v1099_v27  ;;  %v1224_v22 = vrot.slane %v1168_v30, 2 }
 0x16f   : > { %2112 = vmatprep.mubr.msk.f32.mxu1 %vm593_vm4, %v1632_v16  ;;  %v1355_v14 = vmul.f32 %v2623_v10, %v2960_v39  ;;  %v1479_v44 = vmul.f32 %v2628_v11, %v2955_v34  ;;  %v1410_v56 = vrot.slane %v1354_v35, 1  ;;  %v2972_v47 = vmul.f32 %v2628_v11, %v2960_v39 }
 0x170   : > { %v1453_v12 = vadd.f32 %v1409_v1, %v1328_v36  ;;  %v1017_v45 = vadd.f32 %v1001_v13, %v955_v37  ;;  %v1225_v53 = vsel %vm890_vm6, %v1223_v32, %v1224_v22  ;;  %v1313_v33 = vmul.f32 %v2614_v5, %v2955_v34 }
 0x171   : > { %v1411_v54 = vrot.slane %v1355_v14, 1  ;;  %v1535_v55 = vrot.slane %v1479_v44, 2  ;;  %v1536_v21 = vrot.slane %v2972_v47, 2  ;;  %v730_v38 = vmul.f32 %v2566_v48, %v2829_v52 }
 0x172   : > { %v1578_v61 = vadd.f32 %v1534_v43, %v1453_v12  ;;  %v1142_v60 = vadd.f32 %v1100_v17, %v1017_v45  ;;  %v688_v4 = vmul.f32 %v2560_v46, %v2795_v24  ;;  %v856_v63 = vmul.f32 %v2571_v49, %v2829_v52  ;;  %v2995_v52 = vld [vmem:[#allocation2 + $0xa0] sm:$0xff] }
 0x173   : > { %v1412_v1 = vsel %vm764_vm5, %v1410_v56, %v1411_v54  ;;  %v1044_v7 = vmul.f32 %v2592_v58, %v2912_v0  ;;  %v788_v6 = vrot.slane %v730_v38, 1  ;;  %v1002_v51 = vmul.f32 %v2587_v57, %v2877_v2 }
 0x174   : > { %v1601_v8 = vadd.f32 %v2693_v50, %v1578_v61  ;;  %v1267_v41 = vadd.f32 %v1225_v53, %v1142_v60  ;;  %v1537_v9 = vsel %vm890_vm6, %v1535_v55, %v1536_v21  ;;  %v914_v13 = vrot.slane %v856_v63, 2 }
 0x175   : > { %v1101_v15 = vrot.slane %v1044_v7, 1  ;;  %v1169_v24 = vmul.f32 %v2603_v62, %v2912_v0  ;;  %v789_v20 = vsel %vm764_vm5, %v786_v40, %v788_v6  ;;  %v1356_v59 = vmul.f32 %v2623_v10, %v2995_v52 }
 0x176   : > { %v1617_v18 = vmax.f32 %v1601_v8, 0.0  ;;  %v1329_v23 = vadd.f32 %v1313_v33, %v1267_v41  ;;  %v830_v3 = vadd.f32 %v789_v20, %v688_v4  ;;  %v915_v31 = vsel %vm890_vm6, %v912_v19, %v914_v13  ;;  %v3038_v13 = vld [vmem:[#allocation2 + $0xa8] sm:$0xff] }
 0x177   : > { %v1226_v25 = vrot.slane %v1169_v24, 2  ;;  %v1314_v26 = vmul.f32 %v2614_v5, %v2960_v39  ;;  %v1413_v16 = vrot.slane %v1356_v59, 1  ;;  %v1481_v30 = vmul.f32 %v2628_v11, %v2995_v52 }
 0x178   : > { %v1633_v28 = vmin.f32 %v1617_v18, 6.0  ;;  %v1454_v29 = vadd.f32 %v1412_v1, %v1329_v23  ;;  %v956_v32 = vadd.f32 %v915_v31, %v830_v3  ;;  %v1102_v36 = vsel %vm764_vm5, %v1099_v27, %v1101_v15  ;;  %v3043_v23 = vld [vmem:[#allocation2 + $0xb0] sm:$0xff] }
 0x179   : > { %v1227_v40 = vsel %vm890_vm6, %v1224_v22, %v1226_v25  ;;  %v731_v43 = vmul.f32 %v2566_v48, %v2872_v42  ;;  %v1414_v37 = vsel %vm764_vm5, %v1411_v54, %v1413_v16  ;;  %v689_v35 = vmul.f32 %v2560_v46, %v2872_v42 }
 0x17a   : > { %2113 = vmatmul.mubr.msk.f32.gmra.mxu1 %vm593_vm4, %v1633_v28  ;;  %v1579_v19 = vadd.f32 %v1537_v9, %v1454_v29  ;;  %v3015_v17 = vmul.f32 %v2566_v48, %v2877_v2  ;;  %v1018_v14 = vadd.f32 %v1002_v51, %v956_v32  ;;  %v857_v27 = vmul.f32 %v2571_v49, %v2872_v42 }
 0x17b   : > { %v790_v44 = vrot.slane %v731_v43, 1  ;;  %v3021_v22 = vmul.f32 %v2571_v49, %v2877_v2  ;;  %v1538_v45 = vrot.slane %v1481_v30, 2  ;;  %v1003_v53 = vmul.f32 %v2587_v57, %v2955_v34 }
 0x17c   : > { %v1602_v12 = vadd.f32 %v2693_v50, %v1579_v19  ;;  %v791_v56 = vrot.slane %v3015_v17, 1  ;;  %v1143_v33 = vadd.f32 %v1102_v36, %v1018_v14  ;;  %v916_v54 = vrot.slane %v857_v27, 2 }
 0x17d   : > { %v917_v55 = vrot.slane %v3021_v22, 2  ;;  %v1045_v61 = vmul.f32 %v2592_v58, %v2955_v34  ;;  %v1046_v38 = vmul.f32 %v2592_v58, %v2960_v39  ;;  %v1170_v1 = vmul.f32 %v2603_v62, %v2955_v34 }
 0x17e   : > { %v1618_v42 = vmax.f32 %v1602_v12, 0.0  ;;  %v792_v60 = vsel %vm764_vm5, %v790_v44, %v791_v56  ;;  %v1268_v4 = vadd.f32 %v1227_v40, %v1143_v33  ;;  %v1171_v51 = vmul.f32 %v2603_v62, %v2960_v39 }
 0x17f   : > { %v831_v63 = vadd.f32 %v792_v60, %v689_v35  ;;  %v918_v7 = vsel %vm890_vm6, %v916_v54, %v917_v55  ;;  %v1103_v8 = vrot.slane %v1045_v61, 1  ;;  %v1104_v6 = vrot.slane %v1046_v38, 1 }
 0x180   : > { %v1634_v41 = vmin.f32 %v1618_v42, 6.0  ;;  %v1228_v9 = vrot.slane %v1170_v1, 2  ;;  %v1330_v15 = vadd.f32 %v1314_v26, %v1268_v4  ;;  %v1539_v24 = vsel %vm890_vm6, %v1536_v21, %v1538_v45 }
 0x181   : > { %v957_v18 = vadd.f32 %v918_v7, %v831_v63  ;;  %v1357_v20 = vmul.f32 %v2623_v10, %v3038_v13  ;;  %v1105_v59 = vsel %vm764_vm5, %v1103_v8, %v1104_v6  ;;  %v1229_v3 = vrot.slane %v1171_v51, 2 }
 0x182   : > { %2115 = vmatprep.mubr.msk.f32.mxu1 %vm593_vm4, %v1634_v41  ;;  %v1358_v31 = vmul.f32 %v2623_v10, %v3043_v23  ;;  %v1482_v25 = vmul.f32 %v2628_v11, %v3038_v13  ;;  %v1455_v47 = vadd.f32 %v1414_v37, %v1330_v15  ;;  %v3055_v28 = vmul.f32 %v2628_v11, %v3043_v23 }
 0x183   : > { %v1019_v26 = vadd.f32 %v1003_v53, %v957_v18  ;;  %v1415_v21 = vrot.slane %v1357_v20, 1  ;;  %v1230_v29 = vsel %vm890_vm6, %v1228_v9, %v1229_v3  ;;  %v1315_v16 = vmul.f32 %v2614_v5, %v3038_v13 }
 0x184   : > { %v1416_v30 = vrot.slane %v1358_v31, 1  ;;  %v1540_v32 = vrot.slane %v1482_v25, 2  ;;  %v1580_v36 = vadd.f32 %v1539_v24, %v1455_v47  ;;  %v1541_v43 = vrot.slane %v3055_v28, 2 }
 0x185   : > { %v1144_v40 = vadd.f32 %v1105_v59, %v1019_v26  ;;  %v733_v19 = vmul.f32 %v2566_v48, %v2912_v0  ;;  %v690_v35 = vmul.f32 %v2560_v46, %v2877_v2  ;;  %v859_v17 = vmul.f32 %v2571_v49, %v2912_v0  ;;  %v3078_v0 = vld [vmem:[#allocation2 + $0xb8] sm:$0xff] }
 0x186   : > { %v1417_v37 = vsel %vm764_vm5, %v1415_v21, %v1416_v30  ;;  %v1047_v14 = vmul.f32 %v2592_v58, %v2995_v52  ;;  %v1603_v44 = vadd.f32 %v2693_v50, %v1580_v36  ;;  %v1004_v12 = vmul.f32 %v2587_v57, %v2960_v39 }
 0x187   : > { %v1269_v27 = vadd.f32 %v1230_v29, %v1144_v40  ;;  %v793_v22 = vrot.slane %v733_v19, 1  ;;  %v1542_v45 = vsel %vm890_vm6, %v1540_v32, %v1541_v43  ;;  %v919_v53 = vrot.slane %v859_v17, 2 }
 0x188   : > { %v1106_v33 = vrot.slane %v1047_v14, 1  ;;  %v1172_v2 = vmul.f32 %v2603_v62, %v2995_v52  ;;  %v1619_v54 = vmax.f32 %v1603_v44, 0.0  ;;  %v1359_v60 = vmul.f32 %v2623_v10, %v3078_v0 }
 0x189   : > { %v1331_v61 = vadd.f32 %v1315_v16, %v1269_v27  ;;  %v794_v42 = vsel %vm764_vm5, %v791_v56, %v793_v22  ;;  %v920_v1 = vsel %vm890_vm6, %v917_v55, %v919_v53  ;;  %v1316_v63 = vmul.f32 %v2614_v5, %v3043_v23 }
 0x18a   : > { %v832_v38 = vadd.f32 %v794_v42, %v690_v35  ;;  %v1231_v4 = vrot.slane %v1172_v2, 2  ;;  %v1635_v7 = vmin.f32 %v1619_v54, 6.0  ;;  %v1418_v41 = vrot.slane %v1359_v60, 1 }
 0x18b   : > { %v1456_v8 = vadd.f32 %v1417_v37, %v1331_v61  ;;  %v1484_v51 = vmul.f32 %v2628_v11, %v3078_v0  ;;  %v1107_v15 = vsel %vm764_vm5, %v1104_v6, %v1106_v33  ;;  %v734_v24 = vmul.f32 %v2566_v48, %v2955_v34 }
 0x18c   : > { %v958_v9 = vadd.f32 %v920_v1, %v832_v38  ;;  %v1232_v56 = vsel %vm890_vm6, %v1229_v3, %v1231_v4  ;;  %2116 = vmatmul.mubr.msk.f32.gmra.mxu1 %vm593_vm4, %v1635_v7  ;;  %v1419_v18 = vsel %vm764_vm5, %v1416_v30, %v1418_v41  ;;  %v691_v20 = vmul.f32 %v2560_v46, %v2955_v34 }
 0x18d   : > { %v1581_v55 = vadd.f32 %v1542_v45, %v1456_v8  ;;  %v3098_v59 = vmul.f32 %v2566_v48, %v2960_v39  ;;  %v795_v25 = vrot.slane %v734_v24, 1  ;;  %v860_v6 = vmul.f32 %v2571_v49, %v2955_v34  ;;  %v3135_v45 = vld [vmem:[#allocation2 + $0xc8] sm:$0xff]  ;;  %v3157_v8 = vld [vmem:[%s3388_s3 + $0x1] ss:$0 sm:$0xff] }
 0x18e   : > { %v1020_v31 = vadd.f32 %v1004_v12, %v958_v9  ;;  %v3104_v3 = vmul.f32 %v2571_v49, %v2960_v39  ;;  %v1543_v26 = vrot.slane %v1484_v51, 2  ;;  %v1005_v46 = vmul.f32 %v2587_v57, %v3038_v13  ;;  %v3172_v9 = vld [vmem:[%s3388_s3 + $0x2] ss:$0 sm:$0xff] }
 0x18f   : > { %v1604_v47 = vadd.f32 %v2693_v50, %v1581_v55  ;;  %v796_v21 = vrot.slane %v3098_v59, 1  ;;  %v921_v48 = vrot.slane %v860_v6, 2  ;;  %v1048_v30 = vmul.f32 %v2592_v58, %v3038_v13  ;;  %v3219_v59 = vld [vmem:[%s3388_s3 + $0x6] ss:$0 sm:$0xff] }
 0x190   : > { %v1145_v29 = vadd.f32 %v1107_v15, %v1020_v31  ;;  %v922_v16 = vrot.slane %v3104_v3, 2  ;;  %v3118_v32 = vmul.f32 %v2592_v58, %v3043_v23  ;;  %v1173_v36 = vmul.f32 %v2603_v62, %v3038_v13  ;;  %v3130_v58 = vld [vmem:[#allocation2 + $0xc0] sm:$0xff] }
 0x191   : > { %v1620_v34 = vmax.f32 %v1604_v47, 0.0  ;;  %v797_v49 = vsel %vm764_vm5, %v795_v25, %v796_v21  ;;  %v1108_v37 = vrot.slane %v1048_v30, 1  ;;  %v3128_v14 = vmul.f32 %v2603_v62, %v3043_v23  ;;  %v3197_v47 = vld [vmem:[%s3388_s3 + $0x5] ss:$0 sm:$0xff] }
 0x192   : > { %v1270_v57 = vadd.f32 %v1232_v56, %v1145_v29  ;;  %v833_v40 = vadd.f32 %v797_v49, %v691_v20  ;;  %v923_v19 = vsel %vm890_vm6, %v921_v48, %v922_v16  ;;  %v1109_v17 = vrot.slane %v3118_v32, 1  ;;  %v3179_v56 = vld [vmem:[%s3388_s3 + $0x4] ss:$0 sm:$0xff]  ;;  %v3187_v20 = vld [vmem:[%s3388_s3 + $0x3] ss:$0 sm:$0xff] }
 0x193   : > { %v1636_v35 = vmin.f32 %v1620_v34, 6.0  ;;  %v1233_v44 = vrot.slane %v1173_v36, 2  ;;  %v1544_v22 = vsel %vm890_vm6, %v1541_v43, %v1543_v26  ;;  %v1360_v53 = vmul.f32 %v2623_v10, %v3130_v58  ;;  %v3209_v34 = vld [vmem:[%s3388_s3 + $0x7] ss:$0 sm:$0xff] }
 0x194   : > { %v1332_v27 = vadd.f32 %v1316_v63, %v1270_v57  ;;  %v959_v12 = vadd.f32 %v923_v19, %v833_v40  ;;  %v1110_v33 = vsel %vm764_vm5, %v1108_v37, %v1109_v17  ;;  %v1234_v62 = vrot.slane %v3128_v14, 2 }
 0x195   : > { %2118 = vmatprep.mubr.msk.f32.mxu1 %vm593_vm4, %v1636_v35  ;;  %v1361_v2 = vmul.f32 %v2623_v10, %v3135_v45  ;;  %v1485_v28 = vmul.f32 %v2628_v11, %v3130_v58  ;;  %v1420_v61 = vrot.slane %v1360_v53, 1  ;;  %v3148_v42 = vmul.f32 %v2628_v11, %v3135_v45  ;;  %v3226_v35 = vld [vmem:[%s3388_s3 + $0x8] ss:$0 sm:$0xff] }
 0x196   : > { %v1457_v54 = vadd.f32 %v1419_v18, %v1332_v27  ;;  %v1021_v43 = vadd.f32 %v1005_v46, %v959_v12  ;;  %v1235_v60 = vsel %vm890_vm6, %v1233_v44, %v1234_v62  ;;  %v1317_v38 = vmul.f32 %v2614_v5, %v3130_v58  ;;  %v3165_v5 = vld [vmem:[%s3388_s3] ss:$0 sm:$0xff]  ;;  %v3201_v46 = vld [vmem:[#allocation2 + $0xd0] sm:$0xff] }
 0x197   : > { %v1421_v1 = vrot.slane %v1361_v2, 1  ;;  %v1545_v4 = vrot.slane %v1485_v28, 2  ;;  %v1546_v10 = vrot.slane %v3148_v42, 2  ;;  %v736_v11 = vmul.f32 %v3157_v8, %v2995_v52 }
 0x198   : > { %v1582_v63 = vadd.f32 %v1544_v22, %v1457_v54  ;;  %v1146_v7 = vadd.f32 %v1110_v33, %v1021_v43  ;;  %v692_v51 = vmul.f32 %v3165_v5, %v2960_v39  ;;  %v862_v15 = vmul.f32 %v3172_v9, %v2995_v52 }
 0x199   : > { %v1422_v41 = vsel %vm764_vm5, %v1420_v61, %v1421_v1  ;;  %v1050_v24 = vmul.f32 %v3179_v56, %v3078_v0  ;;  %v798_v39 = vrot.slane %v736_v11, 1  ;;  %v1006_v52 = vmul.f32 %v3187_v20, %v3043_v23 }
 0x19a   : > { %v1605_v55 = vadd.f32 %v2693_v50, %v1582_v63  ;;  %v1271_v18 = vadd.f32 %v1235_v60, %v1146_v7  ;;  %v1547_v31 = vsel %vm890_vm6, %v1545_v4, %v1546_v10  ;;  %v924_v25 = vrot.slane %v862_v15, 2 }
 0x19b   : > { %v1111_v6 = vrot.slane %v1050_v24, 1  ;;  %v1175_v26 = vmul.f32 %v3197_v47, %v3078_v0  ;;  %v799_v30 = vsel %vm764_vm5, %v796_v21, %v798_v39  ;;  %v1362_v49 = vmul.f32 %v3209_v34, %v3201_v46 }
 0x19c   : > { %v1621_v29 = vmax.f32 %v1605_v55, 0.0  ;;  %v1333_v48 = vadd.f32 %v1317_v38, %v1271_v18  ;;  %v834_v32 = vadd.f32 %v799_v30, %v692_v51  ;;  %v925_v36 = vsel %vm890_vm6, %v922_v16, %v924_v25  ;;  %v1298_v18 = vld [vmem:[#allocation2 + $0xe0] sm:$0xff] }
 0x19d   : > { %v1236_v57 = vrot.slane %v1175_v26, 2  ;;  %v1318_v21 = vmul.f32 %v3219_v59, %v3135_v45  ;;  %v1423_v37 = vrot.slane %v1362_v49, 1  ;;  %v1487_v3 = vmul.f32 %v3226_v35, %v3201_v46 }
 0x19e   : > { %v1637_v40 = vmin.f32 %v1621_v29, 6.0  ;;  %v1458_v19 = vadd.f32 %v1422_v41, %v1333_v48  ;;  %v960_v16 = vadd.f32 %v925_v36, %v834_v32  ;;  %v1112_v14 = vsel %vm764_vm5, %v1109_v17, %v1111_v6  ;;  %v1297_v41 = vld [vmem:[#allocation2 + $0xd8] sm:$0xff] }
 0x19f   : > { %v1237_v44 = vsel %vm890_vm6, %v1234_v62, %v1236_v57  ;;  %v737_v27 = vmul.f32 %v3157_v8, %v3038_v13  ;;  %v1424_v12 = vsel %vm764_vm5, %v1421_v1, %v1423_v37  ;;  %v693_v53 = vmul.f32 %v3165_v5, %v3038_v13 }
 0x1a0   : > { %2119 = vmatmul.mubr.msk.f32.gmra.mxu1 %vm593_vm4, %v1637_v40  ;;  %v1583_v22 = vadd.f32 %v1547_v31, %v1458_v19  ;;  %v3240_v33 = vmul.f32 %v3157_v8, %v3043_v23  ;;  %v1022_v2 = vadd.f32 %v1006_v52, %v960_v16  ;;  %v863_v17 = vmul.f32 %v3172_v9, %v3038_v13 }
 0x1a1   : > { %v800_v28 = vrot.slane %v737_v27, 1  ;;  %v3246_v62 = vmul.f32 %v3172_v9, %v3043_v23  ;;  %v1548_v43 = vrot.slane %v1487_v3, 2  ;;  %v1007_v60 = vmul.f32 %v3187_v20, %v3130_v58 }
 0x1a2   : > { %v1606_v54 = vadd.f32 %v2693_v50, %v1583_v22  ;;  %v801_v61 = vrot.slane %v3240_v33, 1  ;;  %v1147_v38 = vadd.f32 %v1112_v14, %v1022_v2  ;;  %v926_v1 = vrot.slane %v863_v17, 2 }
 0x1a3   : > { %v927_v4 = vrot.slane %v3246_v62, 2  ;;  %v1051_v63 = vmul.f32 %v3179_v56, %v3130_v58  ;;  %v1052_v11 = vmul.f32 %v3179_v56, %v3135_v45  ;;  %v1176_v50 = vmul.f32 %v3197_v47, %v3130_v58 }
 0x1a4   : > { %v1622_v13 = vmax.f32 %v1606_v54, 0.0  ;;  %v802_v7 = vsel %vm764_vm5, %v800_v28, %v801_v61  ;;  %v1272_v51 = vadd.f32 %v1237_v44, %v1147_v38  ;;  %v1177_v31 = vmul.f32 %v3197_v47, %v3135_v45 }
 0x1a5   : > { %v835_v15 = vadd.f32 %v802_v7, %v693_v53  ;;  %v928_v24 = vsel %vm890_vm6, %v926_v1, %v927_v4  ;;  %v1113_v55 = vrot.slane %v1051_v63, 1  ;;  %v1114_v52 = vrot.slane %v1052_v11, 1  ;;  %v2213_v53 = vld [vmem:[%s3389_s4] ss:$0 sm:$0xff] }
 0x1a6   : > { %v1638_v39 = vmin.f32 %v1622_v13, 6.0  ;;  %v1238_v25 = vrot.slane %v1176_v50, 2  ;;  %v1334_v6 = vadd.f32 %v1318_v21, %v1272_v51  ;;  %v1549_v26 = vsel %vm890_vm6, %v1546_v10, %v1548_v43 }
 0x1a7   : > { %v961_v29 = vadd.f32 %v928_v24, %v835_v15  ;;  %v1363_v58 = vmul.f32 %v3209_v34, %v1297_v41  ;;  %v1115_v48 = vsel %vm764_vm5, %v1113_v55, %v1114_v52  ;;  %v1239_v30 = vrot.slane %v1177_v31, 2 }
 0x1a8   : > { %2121 = vmatprep.mubr.msk.f32.mxu1 %vm593_vm4, %v1638_v39  ;;  %v1364_v49 = vmul.f32 %v3209_v34, %v1298_v18  ;;  %v1488_v32 = vmul.f32 %v3226_v35, %v1297_v41  ;;  %v1459_v36 = vadd.f32 %v1424_v12, %v1334_v6  ;;  %v1489_v21 = vmul.f32 %v3226_v35, %v1298_v18 }
 0x1a9   : > { %v1023_v57 = vadd.f32 %v1007_v60, %v961_v29  ;;  %v1240_v42 = vsel %vm890_vm6, %v1238_v25, %v1239_v30  ;;  %v1319_v10 = vmul.f32 %v3219_v59, %v1297_v41  ;;  %v1425_v40 = vrot.slane %v1363_v58, 1 }
 0x1aa   : > { %v1426_v19 = vrot.slane %v1364_v49, 1  ;;  %v1584_v37 = vadd.f32 %v1549_v26, %v1459_v36  ;;  %v1550_v16 = vrot.slane %v1488_v32, 2  ;;  %v739_v14 = vmul.f32 %v3157_v8, %v3078_v0 }
 0x1ab   : > { %v1148_v3 = vadd.f32 %v1115_v48, %v1023_v57  ;;  %v1551_v44 = vrot.slane %v1489_v21, 2  ;;  %v694_v27 = vmul.f32 %v3165_v5, %v3043_v23  ;;  %v865_v22 = vmul.f32 %v3172_v9, %v3078_v0  ;;  %v1299_v23 = vld [vmem:[#allocation2 + $0xe8] sm:$0xff] }
 0x1ac   : > { %v1053_v12 = vmul.f32 %v3179_v56, %v3201_v46  ;;  %v1607_v33 = vadd.f32 %v2213_v53, %v1584_v37  ;;  %v803_v28 = vrot.slane %v739_v14, 1  ;;  %v1427_v17 = vsel %vm764_vm5, %v1425_v40, %v1426_v19 }
 0x1ad   : > { %v1273_v2 = vadd.f32 %v1240_v42, %v1148_v3  ;;  %v929_v8 = vrot.slane %v865_v22, 2  ;;  %v1178_v62 = vmul.f32 %v3197_v47, %v3201_v46  ;;  %v1552_v56 = vsel %vm890_vm6, %v1550_v16, %v1551_v44 }
 0x1ae   : > { %v1623_v5 = vmax.f32 %v1607_v33, 0.0  ;;  %v804_v0 = vsel %vm764_vm5, %v801_v61, %v803_v28  ;;  %v1116_v9 = vrot.slane %v1053_v12, 1  ;;  %v1008_v38 = vmul.f32 %v3187_v20, %v3135_v45 }
 0x1af   : > { %v1335_v54 = vadd.f32 %v1319_v10, %v1273_v2  ;;  %v836_v43 = vadd.f32 %v804_v0, %v694_v27  ;;  %v930_v60 = vsel %vm890_vm6, %v927_v4, %v929_v8  ;;  %v1241_v13 = vrot.slane %v1178_v62, 2 }
 0x1b0   : > { %v1639_v1 = vmin.f32 %v1623_v5, 6.0  ;;  %v1365_v7 = vmul.f32 %v3209_v34, %v1299_v23  ;;  %v1117_v61 = vsel %vm764_vm5, %v1114_v52, %v1116_v9  ;;  %v1490_v11 = vmul.f32 %v3226_v35, %v1299_v23 }
 0x1b1   : > { %v1460_v63 = vadd.f32 %v1427_v17, %v1335_v54  ;;  %v962_v47 = vadd.f32 %v930_v60, %v836_v43  ;;  %v1242_v4 = vsel %vm890_vm6, %v1239_v30, %v1241_v13  ;;  %v1320_v45 = vmul.f32 %v3219_v59, %v1298_v18  ;;  %v1999_v18 = vld [vmem:[%s3391_s6] ss:$0 sm:$0xff] }
 0x1b2   : > { %2122 = vmatmul.mubr.msk.f32.gmra.mxu1 %vm593_vm4, %v1639_v1  ;;  %v1428_v51 = vrot.slane %v1365_v7, 1  ;;  %v1553_v24 = vrot.slane %v1490_v11, 2 }
 0x1b3   : > { %v1585_v46 = vadd.f32 %v1552_v56, %v1460_v63  ;;  %v1024_v50 = vadd.f32 %v1008_v38, %v962_v47 }
 0x1b4   : > { %v1429_v39 = vsel %vm764_vm5, %v1426_v19, %v1428_v51  ;;  %v1554_v35 = vsel %vm890_vm6, %v1551_v44, %v1553_v24 }
 0x1b5   : > { %v1608_v41 = vadd.f32 %v2213_v53, %v1585_v46  ;;  %v1149_v15 = vadd.f32 %v1117_v61, %v1024_v50 }
 0x1b7   : > { %v1624_v20 = vmax.f32 %v1608_v41, 0.0  ;;  %v1274_v55 = vadd.f32 %v1242_v4, %v1149_v15 }
 0x1b9   : > { %v1640_v34 = vmin.f32 %v1624_v20, 6.0  ;;  %v1336_v31 = vadd.f32 %v1320_v45, %v1274_v55 }
 0x1bb   : > { %2124 = vmatprep.mubr.msk.f32.mxu1 %vm593_vm4, %v1640_v34  ;;  %v1461_v52 = vadd.f32 %v1429_v39, %v1336_v31 }
 0x1bd   : > { %v1586_v25 = vadd.f32 %v1554_v35, %v1461_v52 }
 0x1bf   : > { %v1609_v6 = vadd.f32 %v2213_v53, %v1586_v25 }
 0x1c1   : > { %v1625_v26 = vmax.f32 %v1609_v6, 0.0 }
 0x1c3   : > { %v1641_v59 = vmin.f32 %v1625_v26, 6.0 }
 0x1c5   : > { %2125 = vmatmul.mubr.msk.f32.gmra.mxu1 %vm593_vm4, %v1641_v59 }
 0x200   : > { %v2105_v29 = vpop.f32.mrf.mxu1 }
 0x201   : > { %v1772_v58 = vadd.f32 %v2105_v29, %v1999_v18 }
 0x202   : > { %v1766_v48 = vpop.f32.mrf.mxu1 }
 0x203   : > { %1846 = vst [vmem:[%s2538_s22 + $0x8] sm:$0xff] %v1772_v58  ;;  %v1767_v30 = vadd.f32 %v1999_v18, %v1766_v48 }
 0x205   : > { %1845 = vst [vmem:[%s2538_s22] sm:$0xff] %v1767_v30 }
 0x214   : > { %v2108_v49 = vpop.f32.mrf.mxu1 }
 0x215   : > { %v1782_v32 = vadd.f32 %v2108_v49, %v1999_v18 }
 0x216   : > { %v1776_v36 = vpop.f32.mrf.mxu1 }
 0x217   : > { %1848 = vst [vmem:[%s2538_s22 + $0x18] sm:$0xff] %v1782_v32  ;;  %v1777_v57 = vadd.f32 %v1999_v18, %v1776_v36 }
 0x219   : > { %1847 = vst [vmem:[%s2538_s22 + $0x10] sm:$0xff] %v1777_v57 }
 0x226   : > { %v2111_v21 = vpop.f32.mrf.mxu1 }
 0x227   : > { %v1792_v42 = vadd.f32 %v2111_v21, %v1999_v18 }
 0x228   : > { %v1786_v10 = vpop.f32.mrf.mxu1 }
 0x229   : > { %1850 = vst [vmem:[%s2538_s22 + $0x28] sm:$0xff] %v1792_v42  ;;  %v1787_v40 = vadd.f32 %v1999_v18, %v1786_v10 }
 0x22b   : > { %1849 = vst [vmem:[%s2538_s22 + $0x20] sm:$0xff] %v1787_v40 }
 0x23a   : > { %v2114_v19 = vpop.f32.mrf.mxu1 }
 0x23b   : > { %v1802_v37 = vadd.f32 %v2114_v19, %v1999_v18 }
 0x23c   : > { %v1796_v3 = vpop.f32.mrf.mxu1 }
 0x23d   : > { %1852 = vst [vmem:[%s2538_s22 + $0x38] sm:$0xff] %v1802_v37  ;;  %v1797_v16 = vadd.f32 %v1999_v18, %v1796_v3 }
 0x23f   : > { %1851 = vst [vmem:[%s2538_s22 + $0x30] sm:$0xff] %v1797_v16 }
 0x24c   : > { %v2117_v14 = vpop.f32.mrf.mxu1 }
 0x24d   : > { %v1812_v44 = vadd.f32 %v2117_v14, %v1999_v18 }
 0x24e   : > { %v1806_v27 = vpop.f32.mrf.mxu1 }
 0x24f   : > { %1854 = vst [vmem:[%s2538_s22 + $0x48] sm:$0xff] %v1812_v44  ;;  %v1807_v22 = vadd.f32 %v1999_v18, %v1806_v27 }
 0x251   : > { %1853 = vst [vmem:[%s2538_s22 + $0x40] sm:$0xff] %v1807_v22 }
 0x260   : > { %v2120_v12 = vpop.f32.mrf.mxu1 }
 0x261   : > { %v1822_v53 = vadd.f32 %v2120_v12, %v1999_v18 }
 0x262   : > { %v1816_v33 = vpop.f32.mrf.mxu1 }
 0x263   : > { %1856 = vst [vmem:[%s2538_s22 + $0x58] sm:$0xff] %v1822_v53  ;;  %v1817_v2 = vadd.f32 %v1999_v18, %v1816_v33 }
 0x265   : > { %1855 = vst [vmem:[%s2538_s22 + $0x50] sm:$0xff] %v1817_v2 }
 0x272   : > { %v2123_v28 = vpop.f32.mrf.mxu1 }
 0x273   : > { %v1832_v17 = vadd.f32 %v2123_v28, %v1999_v18 }
 0x274   : > { %v1826_v8 = vpop.f32.mrf.mxu1 }
 0x275   : > { %1858 = vst [vmem:[%s2538_s22 + $0x68] sm:$0xff] %v1832_v17  ;;  %v1827_v62 = vadd.f32 %v1999_v18, %v1826_v8 }
 0x277   : > { %1857 = vst [vmem:[%s2538_s22 + $0x60] sm:$0xff] %v1827_v62 }
 0x285   : > { %v2126_v23 = vpop.f32.mrf.mxu1 }
 0x286   : > { %v1842_v5 = vadd.f32 %v2126_v23, %v1999_v18 }
 0x287   : > { %v1836_v54 = vpop.f32.mrf.mxu1 }
 0x288   : > { %1860 = vst [vmem:[%s2538_s22 + $0x78] sm:$0xff] %v1842_v5  ;;  %v1837_v0 = vadd.f32 %v1999_v18, %v1836_v54 }
 0x28a   : > { %1859 = vst [vmem:[%s2538_s22 + $0x70] sm:$0xff] %v1837_v0 }
 0x28b   : > { %2227 = shalt.err (!%p2224_p9)
}
 0x28c   : > { %s2228_s20 = scalar_lea.hbm %s3326_s16, 2048  ;;  %s2232_s23 = scalar_lea.hbm %s3392_s7, 8192 }
 0x28d   : > { %p2229_p10 = scmp.ne.s32.totalorder %s3326_s16, %s2228_s20  ;;  %p2233_p13 = scmp.lt.s32.totalorder %s3326_s16, %s3392_s7 }
 0x28e   : > { %p2234_p0 = scmp.lt.s32.totalorder %s2232_s23, %s2228_s20 }
 0x28f   : > { %p2230_p11 = pnand %p2229_p10, %p2405_p3 }
 0x290   : > { %p2235_p1 = por %p2234_p0, %p2233_p13 }
 0x291   : > { %p2231_p12 = pneg %p2230_p11 }
 0x293   : > { %p2236_p2 = pnand %p2235_p1, %p2231_p12 }
 0x295   : > { %2239 = shalt.err (!%p2236_p2)
}
 0x296   : > { %s2312_s28 = smov 128   ;;  %s2313_s17 = smov 8  }
 0x297   : > { %2128 = dma.vmem_to_hbm [thread:$0]  (%p2405_p3), %s3328_s10, 2048, %s3326_s16, %s3334_s27, %s2312_s28, %s2312_s28, %s2313_s17  }
 0x298 PF: > { %p2134_p4 = scmp.ge.s32.totalorder %s2306_s8, 2  ;;  %s1893_s18 = sand.u32 1, %s2278_s24  }
 0x299   : > { %s1894_s12 = scalar_lea.sflag [#allocation4], %s1893_s18 }
 0x29a   : > { %p2131_p5 = pnand %p2134_p4, %p2414_p8 }
 0x29c   : > { %p2132_p6 = pneg %p2131_p5 }
 0x29e   : > { %2273 = dma.done.wait (%p2132_p6), %s1894_s12, 2048  }
 0x29f   : > { %2275 = vsyncadd (%p2132_p6), %s1894_s12, 4294965248  ;;  %s20_s8 = sadd.s32 1, %s2306_s8   ;;  %s3399_s14 = sld [smem:[#allocation6_spill]] }
 0x2a0   : > { %p17_p7 = scmp.ge.s32.totalorder %s20_s8, 6   ;;  %s3400_s24 = smov %s2282_s25 }
 0x2a1   : > { %s3401_s25 = smov %s2286_s26  ;;  %s3402_s26 = smov %s2423_s19 }
 0x2a2   : > { %s3403_s27 = smov %s2298_s29  ;;  %s3404_s28 = smov %s2302_s30 }
 0x2a3   : > { %s3405_s29 = smov %s3408_s11  ;;  %19 = sbr.rel (!%p17_p7) target bundleno = 5 (0x5), region = 95 }
 0x2a5   : > { %s3406_s30 = smov %s3399_s14 }
 0x2a8   :  { %1899 = vsyncpa [#allocation4], 1 }
 0x2a9   :  { %1901 = vsyncpa [#allocation4 + $0x1], 1 }

</bundles_post_ra>
